<compile_context>
chip_gen: v7x
topology: tpu7x:2x2x1
jax: 0.10.0
libtpu: 0.0.40
codegen_flags: <defaults>
</compile_context>

<pallas_src>
import functools

import numpy as np
import jax
import jax.numpy as jnp
from jax import lax
from jax.experimental import pallas as pl
from jax.experimental.pallas import tpu as pltpu


def _mhsa_xl_kernel(x_ref, ax_ref, bias_ref,
                    wq_ref, wk_ref, wv_ref, wo_ref, bdk_ref, u_ref, v_ref,
                    o_ref, *, NH, D, N, HpN, L):
    f32 = jnp.float32
    in_dt = x_ref.dtype  # matmul input dtype (f32 or bf16)

    x = x_ref[0]        # [N, E]
    ax = ax_ref[0]      # [HpN, E]
    bias = bias_ref[0]  # [N, HpN]  additive mask bias (f32)

    # All-head projections: one wide MXU matmul each (heads packed in lanes).
    # w_q / u / v were pre-scaled by 1/sqrt(D) in the wrapper.
    q = jnp.dot(x, wq_ref[...], preferred_element_type=f32)    # [N, NH*D]
    k = jnp.dot(ax, wk_ref[...], preferred_element_type=f32)   # [HpN, NH*D]
    vv = jnp.dot(ax, wv_ref[...], preferred_element_type=f32)  # [HpN, NH*D]
    bdk = bdk_ref[...]                                         # [L, NH*D]

    ac_q = (q + u_ref[...]).astype(in_dt)   # [N, NH*D]
    bd_q = (q + v_ref[...]).astype(in_dt)   # [N, NH*D]
    k = k.astype(in_dt)
    vv = vv.astype(in_dt)

    # Per-row left-rotation amounts for the relative shift (head-independent):
    #   BD[i, m] = P[i, (N-1-i) + m]  ->  left-rotate row i by (N-1-i), keep [:HpN].
    # Decompose the per-row rotation into log2(N) masked constant rotations.
    row = lax.broadcasted_iota(jnp.int32, (N, L), 0)
    rot = (N - 1) - row
    n_bits = (N - 1).bit_length()
    bit_masks = [((rot >> b) & 1) == 1 for b in range(n_bits)]

    head_outs = []
    for h in range(NH):
        sl = slice(h * D, (h + 1) * D)

        # Content score AC = (q + u) K^T / sqrt(D)          -> [N, HpN]
        AC = lax.dot_general(ac_q[:, sl], k[:, sl], (((1,), (1,)), ((), ())),
                             preferred_element_type=f32)

        # Position score, full width, one MXU matmul         -> [N, L]
        P = lax.dot_general(bd_q[:, sl], bdk[:, sl], (((1,), (1,)), ((), ())),
                            preferred_element_type=f32)

        # Relative shift via masked rotations (no per-row matmuls / slices).
        cur = P
        for b in range(n_bits):
            rolled = jnp.roll(cur, -(1 << b), axis=1)
            cur = jnp.where(bit_masks[b], rolled, cur)
        BD = cur[:, :HpN]                                    # [N, HpN]

        score = AC + BD + bias                               # [N, HpN] f32

        # Softmax (f32), normalization folded into the PV output.
        m = jnp.max(score, axis=-1, keepdims=True)
        e = jnp.exp(score - m)
        inv = 1.0 / jnp.sum(e, axis=-1, keepdims=True)       # [N, 1]
        attn = jnp.dot(e.astype(in_dt), vv[:, sl],
                       preferred_element_type=f32) * inv     # [N, D]
        head_outs.append(attn)

    # One lane-dense output projection for all heads, single store per batch.
    attn_cat = jnp.concatenate(head_outs, axis=1).astype(in_dt)   # [N, NH*D]
    o_ref[0] = jnp.dot(attn_cat, wo_ref[...], preferred_element_type=f32)


def mhsa_xl_forward(x, params, mask=None, history=None,
                    compute_dtype=jnp.float32):
    """Forward pass of MultiHeadSelfAttentionXL via a Pallas TPU kernel.

    compute_dtype=jnp.bfloat16 is recommended on v6e/v7x (MXU inputs only;
    softmax / mask / accumulation stay f32).
    """
    w_q = params["w_q"]; w_k = params["w_k"]; w_v = params["w_v"]
    w_kr = params["w_kr"]; w_o = params["w_o"]
    u = params["u"]; v = params["v"]; inv_freq = params["inv_freq"]

    B, N, E = x.shape
    NH, _, D = w_q.shape
    NHD = NH * D
    all_x = x if history is None else jnp.concatenate([history, x], axis=1)
    HpN = all_x.shape[1]
    L = HpN + N
    inv_sqrt_d = 1.0 / float(np.sqrt(D))

    # Relative sinusoidal embedding (batch-independent glue).
    pos = jnp.arange(L, dtype=jnp.float32)[:, None] - HpN + 1.0
    freq = pos * inv_freq[None, :].astype(jnp.float32)
    rel = jnp.concatenate([jnp.sin(freq), jnp.cos(freq)], axis=-1)   # [L, E]

    # Head-packed weights (heads in the lane dimension).  Fold 1/sqrt(D) into
    # w_q / u / v so the kernel does no score scaling.
    wq_p = (jnp.transpose(w_q, (1, 0, 2)).reshape(E, NHD) * inv_sqrt_d)
    wk_p = jnp.transpose(w_k, (1, 0, 2)).reshape(E, NHD)
    wv_p = jnp.transpose(w_v, (1, 0, 2)).reshape(E, NHD)
    wo_p = w_o.reshape(NHD, E)
    u_p = (u.reshape(1, NHD) * inv_sqrt_d).astype(jnp.float32)
    v_p = (v.reshape(1, NHD) * inv_sqrt_d).astype(jnp.float32)

    # Batch-independent relative-position keys, precomputed once (hoisted).
    bdk_p = jnp.einsum("le,hed->lhd", rel, w_kr).reshape(L, NHD)

    # Additive mask bias (score + bias), precomputed in the wrapper.
    if mask is None:
        bias = jnp.zeros((B, N, HpN), jnp.float32)
    else:
        bias = (mask.astype(jnp.float32) - 1.0) * 100000000.0

    cd = compute_dtype
    kernel = functools.partial(_mhsa_xl_kernel, NH=NH, D=D, N=N, HpN=HpN, L=L)

    out = pl.pallas_call(
        kernel,
        out_shape=jax.ShapeDtypeStruct((B, N, E), jnp.float32),
        grid_spec=pltpu.PrefetchScalarGridSpec(
            num_scalar_prefetch=0,
            grid=(B,),
            in_specs=[
                pl.BlockSpec((1, N, E), lambda b: (b, 0, 0)),      # x
                pl.BlockSpec((1, HpN, E), lambda b: (b, 0, 0)),    # all_x
                pl.BlockSpec((1, N, HpN), lambda b: (b, 0, 0)),    # mask bias
                pl.BlockSpec((E, NHD), lambda b: (0, 0)),          # w_q (packed, scaled)
                pl.BlockSpec((E, NHD), lambda b: (0, 0)),          # w_k (packed)
                pl.BlockSpec((E, NHD), lambda b: (0, 0)),          # w_v (packed)
                pl.BlockSpec((NHD, E), lambda b: (0, 0)),          # w_o (packed)
                pl.BlockSpec((L, NHD), lambda b: (0, 0)),          # bd_k (packed)
                pl.BlockSpec((1, NHD), lambda b: (0, 0)),          # u (scaled)
                pl.BlockSpec((1, NHD), lambda b: (0, 0)),          # v (scaled)
            ],
            out_specs=pl.BlockSpec((1, N, E), lambda b: (b, 0, 0)),
        ),
        compiler_params=pltpu.CompilerParams(
            dimension_semantics=("parallel",)),
    )(x.astype(cd), all_x.astype(cd), bias,
      wq_p.astype(cd), wk_p.astype(cd), wv_p.astype(cd), wo_p.astype(cd),
      bdk_p.astype(cd), u_p, v_p)
    return out


def mhsa_xl_reference(x, params, mask=None, history=None):
    """Pure-JAX mirror of the PyTorch forward (for correctness check)."""
    w_q = params["w_q"]; w_k = params["w_k"]; w_v = params["w_v"]
    w_kr = params["w_kr"]; w_o = params["w_o"]
    u = params["u"]; v = params["v"]; inv_freq = params["inv_freq"]
    NH, _, D = w_q.shape
    sqrt_d = np.sqrt(D)

    all_x = x if history is None else jnp.concatenate([history, x], axis=1)
    B, N, _ = x.shape
    HpN = all_x.shape[1]

    q = jnp.einsum("blj,njd->bnld", x, w_q)
    BD_q = q + v[:, None]
    AC_q = q + u[:, None]
    AC_k = jnp.einsum("blj,njd->bnld", all_x, w_k)
    AC = jnp.einsum("bnij,bnkj->bnik", AC_q, AC_k) / sqrt_d

    freq = (jnp.arange(HpN + N, dtype=jnp.float32)[:, None] - HpN + 1.0) * inv_freq
    rel = jnp.concatenate([jnp.sin(freq), jnp.cos(freq)], axis=-1)
    BD_k = jnp.einsum("lj,njd->nld", rel, w_kr)
    BD = jnp.einsum("bnij,nkj->bnik", BD_q, BD_k) / sqrt_d
    BD = BD.reshape(B, NH, -1)[..., :-N].reshape(B, NH, N, HpN + N - 1)[..., N - 1:]
    score = AC + BD

    if mask is not None:
        m = mask[:, None]
        score = score * m + (-100000000.0) * (1.0 - m)
    score = jax.nn.softmax(score, axis=-1)

    vv = jnp.einsum("blj,njd->bnld", all_x, w_v)
    out = jnp.einsum("bnij,bnjk->bnik", score, vv)
    out = jnp.einsum("bnlj,njk->blk", out, w_o)
    return out


if __name__ == "__main__":
    B, N, H, E, NH, D = 2, 8, 4, 32, 4, 16
    HpN = H + N

    key = jax.random.PRNGKey(0)
    keys = jax.random.split(key, 9)

    def xavier(k, shape):
        rcpt = int(np.prod(shape[2:])) if len(shape) > 2 else 1
        fan_in = shape[1] * rcpt
        fan_out = shape[0] * rcpt
        std = float(np.sqrt(2.0 / (fan_in + fan_out)))
        return jax.random.normal(k, shape, jnp.float32) * std

    params = {
        "w_q": xavier(keys[0], (NH, E, D)),
        "w_k": xavier(keys[1], (NH, E, D)),
        "w_v": xavier(keys[2], (NH, E, D)),
        "w_kr": xavier(keys[3], (NH, E, D)),
        "w_o": xavier(keys[4], (NH, D, E)),
        "u": 0.1 * jax.random.normal(keys[5], (NH, D), jnp.float32),
        "v": 0.1 * jax.random.normal(keys[6], (NH, D), jnp.float32),
        "inv_freq": (1.0 / (10000.0 ** (jnp.arange(0.0, E, 2.0) / E))).astype(jnp.float32),
    }

    x = jax.random.normal(keys[7], (B, N, E), jnp.float32)
    history = jax.random.normal(keys[8], (B, H, E), jnp.float32)

    # Causal mask over [history ++ current] keys: query i attends to j <= i + H.
    mask2d = (jnp.arange(HpN)[None, :] <= (jnp.arange(N)[:, None] + H)).astype(jnp.float32)
    mask = jnp.broadcast_to(mask2d[None], (B, N, HpN))

    # Exact f32 path: check against the pure-JAX reference.
    out = mhsa_xl_forward(x, params, mask=mask, history=history)
    out = jax.block_until_ready(out)
    ref = mhsa_xl_reference(x, params, mask=mask, history=history)
    np.testing.assert_allclose(np.asarray(out), np.asarray(ref), rtol=1e-4, atol=1e-4)

    # bf16 MXU-input path (recommended on v6e/v7x): just make sure it runs.
    out_bf16 = mhsa_xl_forward(x, params, mask=mask, history=history,
                               compute_dtype=jnp.bfloat16)
    out_bf16 = jax.block_until_ready(out_bf16)
    assert np.isfinite(np.asarray(out_bf16)).all()

    print("KERNEL_OK")
</pallas_src>

<mosaic_0001>
module attributes {stable_mosaic.version = 11 : i64} {
  func.func @_mhsa_xl_kernel(%arg0: i32, %arg1: memref<1x8x32xf32, #tpu.memory_space<vmem>>, %arg2: memref<1x12x32xf32, #tpu.memory_space<vmem>>, %arg3: memref<1x8x12xf32, #tpu.memory_space<vmem>>, %arg4: memref<32x64xf32, #tpu.memory_space<vmem>>, %arg5: memref<32x64xf32, #tpu.memory_space<vmem>>, %arg6: memref<32x64xf32, #tpu.memory_space<vmem>>, %arg7: memref<64x32xf32, #tpu.memory_space<vmem>>, %arg8: memref<20x64xf32, #tpu.memory_space<vmem>>, %arg9: memref<1x64xf32, #tpu.memory_space<vmem>>, %arg10: memref<1x64xf32, #tpu.memory_space<vmem>>, %arg11: memref<1x8x32xf32, #tpu.memory_space<vmem>>) attributes {dimension_semantics = [#tpu.dimension_semantics<parallel>], iteration_bounds = array<i64: 2>, scalar_prefetch = 0 : i64, scratch_operands = 0 : i64, tpu.core_type = #tpu.core_type<tc>, window_params = [{transform_indices = @transform_0, window_bounds = array<i64: 1, 8, 32>}, {transform_indices = @transform_1, window_bounds = array<i64: 1, 12, 32>}, {transform_indices = @transform_2, window_bounds = array<i64: 1, 8, 12>}, {pipeline_mode = #tpu.pipeline_mode<synchronous>, transform_indices = @transform_3, window_bounds = array<i64: 32, 64>}, {pipeline_mode = #tpu.pipeline_mode<synchronous>, transform_indices = @transform_4, window_bounds = array<i64: 32, 64>}, {pipeline_mode = #tpu.pipeline_mode<synchronous>, transform_indices = @transform_5, window_bounds = array<i64: 32, 64>}, {pipeline_mode = #tpu.pipeline_mode<synchronous>, transform_indices = @transform_6, window_bounds = array<i64: 64, 32>}, {pipeline_mode = #tpu.pipeline_mode<synchronous>, transform_indices = @transform_7, window_bounds = array<i64: 20, 64>}, {pipeline_mode = #tpu.pipeline_mode<synchronous>, transform_indices = @transform_8, window_bounds = array<i64: 1, 64>}, {pipeline_mode = #tpu.pipeline_mode<synchronous>, transform_indices = @transform_9, window_bounds = array<i64: 1, 64>}, {transform_indices = @transform_10, window_bounds = array<i64: 1, 8, 32>}]} {
    %c0 = arith.constant 0 : index
    %c0_0 = arith.constant 0 : index
    %c0_1 = arith.constant 0 : index
    %0 = vector.load %arg1[%c0, %c0_0, %c0_1] : memref<1x8x32xf32, #tpu.memory_space<vmem>>, vector<1x8x32xf32>
    %1 = vector.shape_cast %0 : vector<1x8x32xf32> to vector<8x32xf32>
    %c0_2 = arith.constant 0 : index
    %c0_3 = arith.constant 0 : index
    %c0_4 = arith.constant 0 : index
    %2 = vector.load %arg2[%c0_2, %c0_3, %c0_4] : memref<1x12x32xf32, #tpu.memory_space<vmem>>, vector<1x12x32xf32>
    %3 = vector.shape_cast %2 : vector<1x12x32xf32> to vector<12x32xf32>
    %c0_5 = arith.constant 0 : index
    %c0_6 = arith.constant 0 : index
    %c0_7 = arith.constant 0 : index
    %4 = vector.load %arg3[%c0_5, %c0_6, %c0_7] : memref<1x8x12xf32, #tpu.memory_space<vmem>>, vector<1x8x12xf32>
    %5 = vector.shape_cast %4 : vector<1x8x12xf32> to vector<8x12xf32>
    %c0_8 = arith.constant 0 : index
    %c0_9 = arith.constant 0 : index
    %6 = vector.load %arg4[%c0_8, %c0_9] : memref<32x64xf32, #tpu.memory_space<vmem>>, vector<32x64xf32>
    %cst = arith.constant dense<0.000000e+00> : vector<8x64xf32>
    %7 = tpu.matmul %1, %6, %cst {dimension_numbers = #tpu.dot_dimension_numbers<[1], [0], [0], [1], [0, 0, 1, 1], [], []>} : vector<8x32xf32>, vector<32x64xf32>, vector<8x64xf32> -> vector<8x64xf32>
    %c0_10 = arith.constant 0 : index
    %c0_11 = arith.constant 0 : index
    %8 = vector.load %arg5[%c0_10, %c0_11] : memref<32x64xf32, #tpu.memory_space<vmem>>, vector<32x64xf32>
    %cst_12 = arith.constant dense<0.000000e+00> : vector<12x64xf32>
    %9 = tpu.matmul %3, %8, %cst_12 {dimension_numbers = #tpu.dot_dimension_numbers<[1], [0], [0], [1], [0, 0, 1, 1], [], []>} : vector<12x32xf32>, vector<32x64xf32>, vector<12x64xf32> -> vector<12x64xf32>
    %c0_13 = arith.constant 0 : index
    %c0_14 = arith.constant 0 : index
    %10 = vector.load %arg6[%c0_13, %c0_14] : memref<32x64xf32, #tpu.memory_space<vmem>>, vector<32x64xf32>
    %cst_15 = arith.constant dense<0.000000e+00> : vector<12x64xf32>
    %11 = tpu.matmul %3, %10, %cst_15 {dimension_numbers = #tpu.dot_dimension_numbers<[1], [0], [0], [1], [0, 0, 1, 1], [], []>} : vector<12x32xf32>, vector<32x64xf32>, vector<12x64xf32> -> vector<12x64xf32>
    %c0_16 = arith.constant 0 : index
    %c0_17 = arith.constant 0 : index
    %12 = vector.load %arg8[%c0_16, %c0_17] : memref<20x64xf32, #tpu.memory_space<vmem>>, vector<20x64xf32>
    %c0_18 = arith.constant 0 : index
    %c0_19 = arith.constant 0 : index
    %13 = vector.load %arg9[%c0_18, %c0_19] : memref<1x64xf32, #tpu.memory_space<vmem>>, vector<1x64xf32>
    %14 = vector.broadcast %13 : vector<1x64xf32> to vector<8x64xf32>
    %15 = arith.addf %7, %14 : vector<8x64xf32>
    %c0_20 = arith.constant 0 : index
    %c0_21 = arith.constant 0 : index
    %16 = vector.load %arg10[%c0_20, %c0_21] : memref<1x64xf32, #tpu.memory_space<vmem>>, vector<1x64xf32>
    %17 = vector.broadcast %16 : vector<1x64xf32> to vector<8x64xf32>
    %18 = arith.addf %7, %17 : vector<8x64xf32>
    %19 = tpu.iota {dimensions = array<i32: 0>} : vector<8x20xi32>
    %c7_i32 = arith.constant 7 : i32
    %20 = vector.broadcast %c7_i32 : i32 to vector<8x20xi32>
    %21 = arith.subi %20, %19 : vector<8x20xi32>
    %c0_i32 = arith.constant 0 : i32
    %22 = vector.broadcast %c0_i32 : i32 to vector<8x20xi32>
    %23 = arith.shrsi %21, %22 : vector<8x20xi32>
    %c1_i32 = arith.constant 1 : i32
    %24 = vector.broadcast %c1_i32 : i32 to vector<8x20xi32>
    %25 = arith.andi %23, %24 : vector<8x20xi32>
    %c1_i32_22 = arith.constant 1 : i32
    %26 = vector.broadcast %c1_i32_22 : i32 to vector<8x20xi32>
    %27 = arith.cmpi eq, %25, %26 : vector<8x20xi32>
    %c1_i32_23 = arith.constant 1 : i32
    %28 = vector.broadcast %c1_i32_23 : i32 to vector<8x20xi32>
    %29 = arith.shrsi %21, %28 : vector<8x20xi32>
    %c1_i32_24 = arith.constant 1 : i32
    %30 = vector.broadcast %c1_i32_24 : i32 to vector<8x20xi32>
    %31 = arith.andi %29, %30 : vector<8x20xi32>
    %c1_i32_25 = arith.constant 1 : i32
    %32 = vector.broadcast %c1_i32_25 : i32 to vector<8x20xi32>
    %33 = arith.cmpi eq, %31, %32 : vector<8x20xi32>
    %c2_i32 = arith.constant 2 : i32
    %34 = vector.broadcast %c2_i32 : i32 to vector<8x20xi32>
    %35 = arith.shrsi %21, %34 : vector<8x20xi32>
    %c1_i32_26 = arith.constant 1 : i32
    %36 = vector.broadcast %c1_i32_26 : i32 to vector<8x20xi32>
    %37 = arith.andi %35, %36 : vector<8x20xi32>
    %c1_i32_27 = arith.constant 1 : i32
    %38 = vector.broadcast %c1_i32_27 : i32 to vector<8x20xi32>
    %39 = arith.cmpi eq, %37, %38 : vector<8x20xi32>
    %40 = vector.extract_strided_slice %15 {offsets = [0, 0], sizes = [8, 16], strides = [1, 1]} : vector<8x64xf32> to vector<8x16xf32>
    %41 = vector.extract_strided_slice %9 {offsets = [0, 0], sizes = [12, 16], strides = [1, 1]} : vector<12x64xf32> to vector<12x16xf32>
    %cst_28 = arith.constant dense<0.000000e+00> : vector<8x12xf32>
    %42 = tpu.matmul %40, %41, %cst_28 {dimension_numbers = #tpu.dot_dimension_numbers<[1], [1], [0], [0], [0, 0, 1, 0], [], []>} : vector<8x16xf32>, vector<12x16xf32>, vector<8x12xf32> -> vector<8x12xf32>
    %43 = vector.extract_strided_slice %18 {offsets = [0, 0], sizes = [8, 16], strides = [1, 1]} : vector<8x64xf32> to vector<8x16xf32>
    %44 = vector.extract_strided_slice %12 {offsets = [0, 0], sizes = [20, 16], strides = [1, 1]} : vector<20x64xf32> to vector<20x16xf32>
    %cst_29 = arith.constant dense<0.000000e+00> : vector<8x20xf32>
    %45 = tpu.matmul %43, %44, %cst_29 {dimension_numbers = #tpu.dot_dimension_numbers<[1], [1], [0], [0], [0, 0, 1, 0], [], []>} : vector<8x16xf32>, vector<20x16xf32>, vector<8x20xf32> -> vector<8x20xf32>
    %46 = vector.extract_strided_slice %45 {offsets = [0, 1], sizes = [8, 19], strides = [1, 1]} : vector<8x20xf32> to vector<8x19xf32>
    %47 = vector.extract_strided_slice %45 {offsets = [0, 0], sizes = [8, 1], strides = [1, 1]} : vector<8x20xf32> to vector<8x1xf32>
    %48 = tpu.concatenate %46, %47 in 1 : vector<8x19xf32>, vector<8x1xf32> -> vector<8x20xf32>
    %49 = arith.select %27, %48, %45 : vector<8x20xi1>, vector<8x20xf32>
    %50 = vector.extract_strided_slice %49 {offsets = [0, 2], sizes = [8, 18], strides = [1, 1]} : vector<8x20xf32> to vector<8x18xf32>
    %51 = vector.extract_strided_slice %49 {offsets = [0, 0], sizes = [8, 2], strides = [1, 1]} : vector<8x20xf32> to vector<8x2xf32>
    %52 = tpu.concatenate %50, %51 in 1 : vector<8x18xf32>, vector<8x2xf32> -> vector<8x20xf32>
    %53 = arith.select %33, %52, %49 : vector<8x20xi1>, vector<8x20xf32>
    %54 = vector.extract_strided_slice %53 {offsets = [0, 4], sizes = [8, 16], strides = [1, 1]} : vector<8x20xf32> to vector<8x16xf32>
    %55 = vector.extract_strided_slice %53 {offsets = [0, 0], sizes = [8, 4], strides = [1, 1]} : vector<8x20xf32> to vector<8x4xf32>
    %56 = tpu.concatenate %54, %55 in 1 : vector<8x16xf32>, vector<8x4xf32> -> vector<8x20xf32>
    %57 = arith.select %39, %56, %53 : vector<8x20xi1>, vector<8x20xf32>
    %58 = vector.extract_strided_slice %57 {offsets = [0, 0], sizes = [8, 12], strides = [1, 1]} : vector<8x20xf32> to vector<8x12xf32>
    %59 = arith.addf %42, %58 : vector<8x12xf32>
    %60 = arith.addf %59, %5 : vector<8x12xf32>
    %cst_30 = arith.constant dense<0xFF800000> : vector<8xf32>
    %61 = vector.multi_reduction <maximumf>, %60, %cst_30 [1] : vector<8x12xf32> to vector<8xf32>
    %62 = vector.shape_cast %61 : vector<8xf32> to vector<8x1xf32>
    %63 = vector.broadcast %62 : vector<8x1xf32> to vector<8x12xf32>
    %64 = arith.subf %60, %63 : vector<8x12xf32>
    %65 = math.exp %64 : vector<8x12xf32>
    %cst_31 = arith.constant dense<0.000000e+00> : vector<8xf32>
    %66 = vector.multi_reduction <add>, %65, %cst_31 [1] : vector<8x12xf32> to vector<8xf32>
    %67 = vector.shape_cast %66 : vector<8xf32> to vector<8x1xf32>
    %cst_32 = arith.constant 1.000000e+00 : f32
    %68 = vector.broadcast %cst_32 : f32 to vector<8x1xf32>
    %69 = arith.divf %68, %67 : vector<8x1xf32>
    %70 = vector.extract_strided_slice %11 {offsets = [0, 0], sizes = [12, 16], strides = [1, 1]} : vector<12x64xf32> to vector<12x16xf32>
    %cst_33 = arith.constant dense<0.000000e+00> : vector<8x16xf32>
    %71 = tpu.matmul %65, %70, %cst_33 {dimension_numbers = #tpu.dot_dimension_numbers<[1], [0], [0], [1], [0, 0, 1, 1], [], []>} : vector<8x12xf32>, vector<12x16xf32>, vector<8x16xf32> -> vector<8x16xf32>
    %72 = vector.broadcast %69 : vector<8x1xf32> to vector<8x16xf32>
    %73 = arith.mulf %71, %72 : vector<8x16xf32>
    %74 = vector.extract_strided_slice %15 {offsets = [0, 16], sizes = [8, 16], strides = [1, 1]} : vector<8x64xf32> to vector<8x16xf32>
    %75 = vector.extract_strided_slice %9 {offsets = [0, 16], sizes = [12, 16], strides = [1, 1]} : vector<12x64xf32> to vector<12x16xf32>
    %cst_34 = arith.constant dense<0.000000e+00> : vector<8x12xf32>
    %76 = tpu.matmul %74, %75, %cst_34 {dimension_numbers = #tpu.dot_dimension_numbers<[1], [1], [0], [0], [0, 0, 1, 0], [], []>} : vector<8x16xf32>, vector<12x16xf32>, vector<8x12xf32> -> vector<8x12xf32>
    %77 = vector.extract_strided_slice %18 {offsets = [0, 16], sizes = [8, 16], strides = [1, 1]} : vector<8x64xf32> to vector<8x16xf32>
    %78 = vector.extract_strided_slice %12 {offsets = [0, 16], sizes = [20, 16], strides = [1, 1]} : vector<20x64xf32> to vector<20x16xf32>
    %cst_35 = arith.constant dense<0.000000e+00> : vector<8x20xf32>
    %79 = tpu.matmul %77, %78, %cst_35 {dimension_numbers = #tpu.dot_dimension_numbers<[1], [1], [0], [0], [0, 0, 1, 0], [], []>} : vector<8x16xf32>, vector<20x16xf32>, vector<8x20xf32> -> vector<8x20xf32>
    %80 = vector.extract_strided_slice %79 {offsets = [0, 1], sizes = [8, 19], strides = [1, 1]} : vector<8x20xf32> to vector<8x19xf32>
    %81 = vector.extract_strided_slice %79 {offsets = [0, 0], sizes = [8, 1], strides = [1, 1]} : vector<8x20xf32> to vector<8x1xf32>
    %82 = tpu.concatenate %80, %81 in 1 : vector<8x19xf32>, vector<8x1xf32> -> vector<8x20xf32>
    %83 = arith.select %27, %82, %79 : vector<8x20xi1>, vector<8x20xf32>
    %84 = vector.extract_strided_slice %83 {offsets = [0, 2], sizes = [8, 18], strides = [1, 1]} : vector<8x20xf32> to vector<8x18xf32>
    %85 = vector.extract_strided_slice %83 {offsets = [0, 0], sizes = [8, 2], strides = [1, 1]} : vector<8x20xf32> to vector<8x2xf32>
    %86 = tpu.concatenate %84, %85 in 1 : vector<8x18xf32>, vector<8x2xf32> -> vector<8x20xf32>
    %87 = arith.select %33, %86, %83 : vector<8x20xi1>, vector<8x20xf32>
    %88 = vector.extract_strided_slice %87 {offsets = [0, 4], sizes = [8, 16], strides = [1, 1]} : vector<8x20xf32> to vector<8x16xf32>
    %89 = vector.extract_strided_slice %87 {offsets = [0, 0], sizes = [8, 4], strides = [1, 1]} : vector<8x20xf32> to vector<8x4xf32>
    %90 = tpu.concatenate %88, %89 in 1 : vector<8x16xf32>, vector<8x4xf32> -> vector<8x20xf32>
    %91 = arith.select %39, %90, %87 : vector<8x20xi1>, vector<8x20xf32>
    %92 = vector.extract_strided_slice %91 {offsets = [0, 0], sizes = [8, 12], strides = [1, 1]} : vector<8x20xf32> to vector<8x12xf32>
    %93 = arith.addf %76, %92 : vector<8x12xf32>
    %94 = arith.addf %93, %5 : vector<8x12xf32>
    %cst_36 = arith.constant dense<0xFF800000> : vector<8xf32>
    %95 = vector.multi_reduction <maximumf>, %94, %cst_36 [1] : vector<8x12xf32> to vector<8xf32>
    %96 = vector.shape_cast %95 : vector<8xf32> to vector<8x1xf32>
    %97 = vector.broadcast %96 : vector<8x1xf32> to vector<8x12xf32>
    %98 = arith.subf %94, %97 : vector<8x12xf32>
    %99 = math.exp %98 : vector<8x12xf32>
    %cst_37 = arith.constant dense<0.000000e+00> : vector<8xf32>
    %100 = vector.multi_reduction <add>, %99, %cst_37 [1] : vector<8x12xf32> to vector<8xf32>
    %101 = vector.shape_cast %100 : vector<8xf32> to vector<8x1xf32>
    %cst_38 = arith.constant 1.000000e+00 : f32
    %102 = vector.broadcast %cst_38 : f32 to vector<8x1xf32>
    %103 = arith.divf %102, %101 : vector<8x1xf32>
    %104 = vector.extract_strided_slice %11 {offsets = [0, 16], sizes = [12, 16], strides = [1, 1]} : vector<12x64xf32> to vector<12x16xf32>
    %cst_39 = arith.constant dense<0.000000e+00> : vector<8x16xf32>
    %105 = tpu.matmul %99, %104, %cst_39 {dimension_numbers = #tpu.dot_dimension_numbers<[1], [0], [0], [1], [0, 0, 1, 1], [], []>} : vector<8x12xf32>, vector<12x16xf32>, vector<8x16xf32> -> vector<8x16xf32>
    %106 = vector.broadcast %103 : vector<8x1xf32> to vector<8x16xf32>
    %107 = arith.mulf %105, %106 : vector<8x16xf32>
    %108 = vector.extract_strided_slice %15 {offsets = [0, 32], sizes = [8, 16], strides = [1, 1]} : vector<8x64xf32> to vector<8x16xf32>
    %109 = vector.extract_strided_slice %9 {offsets = [0, 32], sizes = [12, 16], strides = [1, 1]} : vector<12x64xf32> to vector<12x16xf32>
    %cst_40 = arith.constant dense<0.000000e+00> : vector<8x12xf32>
    %110 = tpu.matmul %108, %109, %cst_40 {dimension_numbers = #tpu.dot_dimension_numbers<[1], [1], [0], [0], [0, 0, 1, 0], [], []>} : vector<8x16xf32>, vector<12x16xf32>, vector<8x12xf32> -> vector<8x12xf32>
    %111 = vector.extract_strided_slice %18 {offsets = [0, 32], sizes = [8, 16], strides = [1, 1]} : vector<8x64xf32> to vector<8x16xf32>
    %112 = vector.extract_strided_slice %12 {offsets = [0, 32], sizes = [20, 16], strides = [1, 1]} : vector<20x64xf32> to vector<20x16xf32>
    %cst_41 = arith.constant dense<0.000000e+00> : vector<8x20xf32>
    %113 = tpu.matmul %111, %112, %cst_41 {dimension_numbers = #tpu.dot_dimension_numbers<[1], [1], [0], [0], [0, 0, 1, 0], [], []>} : vector<8x16xf32>, vector<20x16xf32>, vector<8x20xf32> -> vector<8x20xf32>
    %114 = vector.extract_strided_slice %113 {offsets = [0, 1], sizes = [8, 19], strides = [1, 1]} : vector<8x20xf32> to vector<8x19xf32>
    %115 = vector.extract_strided_slice %113 {offsets = [0, 0], sizes = [8, 1], strides = [1, 1]} : vector<8x20xf32> to vector<8x1xf32>
    %116 = tpu.concatenate %114, %115 in 1 : vector<8x19xf32>, vector<8x1xf32> -> vector<8x20xf32>
    %117 = arith.select %27, %116, %113 : vector<8x20xi1>, vector<8x20xf32>
    %118 = vector.extract_strided_slice %117 {offsets = [0, 2], sizes = [8, 18], strides = [1, 1]} : vector<8x20xf32> to vector<8x18xf32>
    %119 = vector.extract_strided_slice %117 {offsets = [0, 0], sizes = [8, 2], strides = [1, 1]} : vector<8x20xf32> to vector<8x2xf32>
    %120 = tpu.concatenate %118, %119 in 1 : vector<8x18xf32>, vector<8x2xf32> -> vector<8x20xf32>
    %121 = arith.select %33, %120, %117 : vector<8x20xi1>, vector<8x20xf32>
    %122 = vector.extract_strided_slice %121 {offsets = [0, 4], sizes = [8, 16], strides = [1, 1]} : vector<8x20xf32> to vector<8x16xf32>
    %123 = vector.extract_strided_slice %121 {offsets = [0, 0], sizes = [8, 4], strides = [1, 1]} : vector<8x20xf32> to vector<8x4xf32>
    %124 = tpu.concatenate %122, %123 in 1 : vector<8x16xf32>, vector<8x4xf32> -> vector<8x20xf32>
    %125 = arith.select %39, %124, %121 : vector<8x20xi1>, vector<8x20xf32>
    %126 = vector.extract_strided_slice %125 {offsets = [0, 0], sizes = [8, 12], strides = [1, 1]} : vector<8x20xf32> to vector<8x12xf32>
    %127 = arith.addf %110, %126 : vector<8x12xf32>
    %128 = arith.addf %127, %5 : vector<8x12xf32>
    %cst_42 = arith.constant dense<0xFF800000> : vector<8xf32>
    %129 = vector.multi_reduction <maximumf>, %128, %cst_42 [1] : vector<8x12xf32> to vector<8xf32>
    %130 = vector.shape_cast %129 : vector<8xf32> to vector<8x1xf32>
    %131 = vector.broadcast %130 : vector<8x1xf32> to vector<8x12xf32>
    %132 = arith.subf %128, %131 : vector<8x12xf32>
    %133 = math.exp %132 : vector<8x12xf32>
    %cst_43 = arith.constant dense<0.000000e+00> : vector<8xf32>
    %134 = vector.multi_reduction <add>, %133, %cst_43 [1] : vector<8x12xf32> to vector<8xf32>
    %135 = vector.shape_cast %134 : vector<8xf32> to vector<8x1xf32>
    %cst_44 = arith.constant 1.000000e+00 : f32
    %136 = vector.broadcast %cst_44 : f32 to vector<8x1xf32>
    %137 = arith.divf %136, %135 : vector<8x1xf32>
    %138 = vector.extract_strided_slice %11 {offsets = [0, 32], sizes = [12, 16], strides = [1, 1]} : vector<12x64xf32> to vector<12x16xf32>
    %cst_45 = arith.constant dense<0.000000e+00> : vector<8x16xf32>
    %139 = tpu.matmul %133, %138, %cst_45 {dimension_numbers = #tpu.dot_dimension_numbers<[1], [0], [0], [1], [0, 0, 1, 1], [], []>} : vector<8x12xf32>, vector<12x16xf32>, vector<8x16xf32> -> vector<8x16xf32>
    %140 = vector.broadcast %137 : vector<8x1xf32> to vector<8x16xf32>
    %141 = arith.mulf %139, %140 : vector<8x16xf32>
    %142 = vector.extract_strided_slice %15 {offsets = [0, 48], sizes = [8, 16], strides = [1, 1]} : vector<8x64xf32> to vector<8x16xf32>
    %143 = vector.extract_strided_slice %9 {offsets = [0, 48], sizes = [12, 16], strides = [1, 1]} : vector<12x64xf32> to vector<12x16xf32>
    %cst_46 = arith.constant dense<0.000000e+00> : vector<8x12xf32>
    %144 = tpu.matmul %142, %143, %cst_46 {dimension_numbers = #tpu.dot_dimension_numbers<[1], [1], [0], [0], [0, 0, 1, 0], [], []>} : vector<8x16xf32>, vector<12x16xf32>, vector<8x12xf32> -> vector<8x12xf32>
    %145 = vector.extract_strided_slice %18 {offsets = [0, 48], sizes = [8, 16], strides = [1, 1]} : vector<8x64xf32> to vector<8x16xf32>
    %146 = vector.extract_strided_slice %12 {offsets = [0, 48], sizes = [20, 16], strides = [1, 1]} : vector<20x64xf32> to vector<20x16xf32>
    %cst_47 = arith.constant dense<0.000000e+00> : vector<8x20xf32>
    %147 = tpu.matmul %145, %146, %cst_47 {dimension_numbers = #tpu.dot_dimension_numbers<[1], [1], [0], [0], [0, 0, 1, 0], [], []>} : vector<8x16xf32>, vector<20x16xf32>, vector<8x20xf32> -> vector<8x20xf32>
    %148 = vector.extract_strided_slice %147 {offsets = [0, 1], sizes = [8, 19], strides = [1, 1]} : vector<8x20xf32> to vector<8x19xf32>
    %149 = vector.extract_strided_slice %147 {offsets = [0, 0], sizes = [8, 1], strides = [1, 1]} : vector<8x20xf32> to vector<8x1xf32>
    %150 = tpu.concatenate %148, %149 in 1 : vector<8x19xf32>, vector<8x1xf32> -> vector<8x20xf32>
    %151 = arith.select %27, %150, %147 : vector<8x20xi1>, vector<8x20xf32>
    %152 = vector.extract_strided_slice %151 {offsets = [0, 2], sizes = [8, 18], strides = [1, 1]} : vector<8x20xf32> to vector<8x18xf32>
    %153 = vector.extract_strided_slice %151 {offsets = [0, 0], sizes = [8, 2], strides = [1, 1]} : vector<8x20xf32> to vector<8x2xf32>
    %154 = tpu.concatenate %152, %153 in 1 : vector<8x18xf32>, vector<8x2xf32> -> vector<8x20xf32>
    %155 = arith.select %33, %154, %151 : vector<8x20xi1>, vector<8x20xf32>
    %156 = vector.extract_strided_slice %155 {offsets = [0, 4], sizes = [8, 16], strides = [1, 1]} : vector<8x20xf32> to vector<8x16xf32>
    %157 = vector.extract_strided_slice %155 {offsets = [0, 0], sizes = [8, 4], strides = [1, 1]} : vector<8x20xf32> to vector<8x4xf32>
    %158 = tpu.concatenate %156, %157 in 1 : vector<8x16xf32>, vector<8x4xf32> -> vector<8x20xf32>
    %159 = arith.select %39, %158, %155 : vector<8x20xi1>, vector<8x20xf32>
    %160 = vector.extract_strided_slice %159 {offsets = [0, 0], sizes = [8, 12], strides = [1, 1]} : vector<8x20xf32> to vector<8x12xf32>
    %161 = arith.addf %144, %160 : vector<8x12xf32>
    %162 = arith.addf %161, %5 : vector<8x12xf32>
    %cst_48 = arith.constant dense<0xFF800000> : vector<8xf32>
    %163 = vector.multi_reduction <maximumf>, %162, %cst_48 [1] : vector<8x12xf32> to vector<8xf32>
    %164 = vector.shape_cast %163 : vector<8xf32> to vector<8x1xf32>
    %165 = vector.broadcast %164 : vector<8x1xf32> to vector<8x12xf32>
    %166 = arith.subf %162, %165 : vector<8x12xf32>
    %167 = math.exp %166 : vector<8x12xf32>
    %cst_49 = arith.constant dense<0.000000e+00> : vector<8xf32>
    %168 = vector.multi_reduction <add>, %167, %cst_49 [1] : vector<8x12xf32> to vector<8xf32>
    %169 = vector.shape_cast %168 : vector<8xf32> to vector<8x1xf32>
    %cst_50 = arith.constant 1.000000e+00 : f32
    %170 = vector.broadcast %cst_50 : f32 to vector<8x1xf32>
    %171 = arith.divf %170, %169 : vector<8x1xf32>
    %172 = vector.extract_strided_slice %11 {offsets = [0, 48], sizes = [12, 16], strides = [1, 1]} : vector<12x64xf32> to vector<12x16xf32>
    %cst_51 = arith.constant dense<0.000000e+00> : vector<8x16xf32>
    %173 = tpu.matmul %167, %172, %cst_51 {dimension_numbers = #tpu.dot_dimension_numbers<[1], [0], [0], [1], [0, 0, 1, 1], [], []>} : vector<8x12xf32>, vector<12x16xf32>, vector<8x16xf32> -> vector<8x16xf32>
    %174 = vector.broadcast %171 : vector<8x1xf32> to vector<8x16xf32>
    %175 = arith.mulf %173, %174 : vector<8x16xf32>
    %176 = tpu.concatenate %73, %107, %141, %175 in 1 : vector<8x16xf32>, vector<8x16xf32>, vector<8x16xf32>, vector<8x16xf32> -> vector<8x64xf32>
    %c0_52 = arith.constant 0 : index
    %c0_53 = arith.constant 0 : index
    %177 = vector.load %arg7[%c0_52, %c0_53] : memref<64x32xf32, #tpu.memory_space<vmem>>, vector<64x32xf32>
    %cst_54 = arith.constant dense<0.000000e+00> : vector<8x32xf32>
    %178 = tpu.matmul %176, %177, %cst_54 {dimension_numbers = #tpu.dot_dimension_numbers<[1], [0], [0], [1], [0, 0, 1, 1], [], []>} : vector<8x64xf32>, vector<64x32xf32>, vector<8x32xf32> -> vector<8x32xf32>
    %c0_55 = arith.constant 0 : index
    %c0_56 = arith.constant 0 : index
    %c0_57 = arith.constant 0 : index
    %179 = vector.load %arg11[%c0_55, %c0_56, %c0_57] : memref<1x8x32xf32, #tpu.memory_space<vmem>>, vector<1x8x32xf32>
    %180 = vector.shape_cast %179 : vector<1x8x32xf32> to vector<8x32xf32>
    %181 = vector.shape_cast %178 : vector<8x32xf32> to vector<1x8x32xf32>
    tpu.vector_store %arg11[%c0_55, %c0_56, %c0_57], %181 {strides = array<i32>} : memref<1x8x32xf32, #tpu.memory_space<vmem>>, vector<1x8x32xf32>,
    return
  }
  func.func @transform_0(%arg0: i32) -> (i32, i32, i32) {
    %c0_i32 = arith.constant 0 : i32
    %c0_i32_0 = arith.constant 0 : i32
    %c0_i32_1 = arith.constant 0 : i32
    return %arg0, %c0_i32, %c0_i32_0 : i32, i32, i32
  }
  func.func @transform_1(%arg0: i32) -> (i32, i32, i32) {
    %c0_i32 = arith.constant 0 : i32
    %c0_i32_0 = arith.constant 0 : i32
    %c0_i32_1 = arith.constant 0 : i32
    return %arg0, %c0_i32, %c0_i32_0 : i32, i32, i32
  }
  func.func @transform_2(%arg0: i32) -> (i32, i32, i32) {
    %c0_i32 = arith.constant 0 : i32
    %c0_i32_0 = arith.constant 0 : i32
    %c0_i32_1 = arith.constant 0 : i32
    return %arg0, %c0_i32, %c0_i32_0 : i32, i32, i32
  }
  func.func @transform_3(%arg0: i32) -> (i32, i32) {
    %c0_i32 = arith.constant 0 : i32
    %c0_i32_0 = arith.constant 0 : i32
    %c0_i32_1 = arith.constant 0 : i32
    return %c0_i32, %c0_i32_0 : i32, i32
  }
  func.func @transform_4(%arg0: i32) -> (i32, i32) {
    %c0_i32 = arith.constant 0 : i32
    %c0_i32_0 = arith.constant 0 : i32
    %c0_i32_1 = arith.constant 0 : i32
    return %c0_i32, %c0_i32_0 : i32, i32
  }
  func.func @transform_5(%arg0: i32) -> (i32, i32) {
    %c0_i32 = arith.constant 0 : i32
    %c0_i32_0 = arith.constant 0 : i32
    %c0_i32_1 = arith.constant 0 : i32
    return %c0_i32, %c0_i32_0 : i32, i32
  }
  func.func @transform_6(%arg0: i32) -> (i32, i32) {
    %c0_i32 = arith.constant 0 : i32
    %c0_i32_0 = arith.constant 0 : i32
    %c0_i32_1 = arith.constant 0 : i32
    return %c0_i32, %c0_i32_0 : i32, i32
  }
  func.func @transform_7(%arg0: i32) -> (i32, i32) {
    %c0_i32 = arith.constant 0 : i32
    %c0_i32_0 = arith.constant 0 : i32
    %c0_i32_1 = arith.constant 0 : i32
    return %c0_i32, %c0_i32_0 : i32, i32
  }
  func.func @transform_8(%arg0: i32) -> (i32, i32) {
    %c0_i32 = arith.constant 0 : i32
    %c0_i32_0 = arith.constant 0 : i32
    %c0_i32_1 = arith.constant 0 : i32
    return %c0_i32, %c0_i32_0 : i32, i32
  }
  func.func @transform_9(%arg0: i32) -> (i32, i32) {
    %c0_i32 = arith.constant 0 : i32
    %c0_i32_0 = arith.constant 0 : i32
    %c0_i32_1 = arith.constant 0 : i32
    return %c0_i32, %c0_i32_0 : i32, i32
  }
  func.func @transform_10(%arg0: i32) -> (i32, i32, i32) {
    %c0_i32 = arith.constant 0 : i32
    %c0_i32_0 = arith.constant 0 : i32
    %c0_i32_1 = arith.constant 0 : i32
    return %arg0, %c0_i32, %c0_i32_0 : i32, i32, i32
  }
}

</mosaic_0001>

<bundles_post_ra>
// kernel: tpu_custom_call.1
= control target key start
LH: loop header
LB: loop body
LE: loop exit
PB: predicated region body
PF: predicated region fallthrough
CT: control target
= control target key end

     0   :  { %s3315_s0 = inlined_call_operand.hbm [shape: f32[2,8,32], index: 0, kind: input, shape index: {}]   ;;  %s3316_s1 = inlined_call_operand.vmem [shape: f32[2,12,32], index: 1, kind: input, shape index: {}]   ;;  %s3317_s2 = inlined_call_operand.hbm [shape: f32[2,8,12], index: 2, kind: input, shape index: {}]   ;;  %s3318_s3 = inlined_call_operand.vmem [shape: f32[32,64], index: 3, kind: input, shape index: {}]   ;;  %s3319_s4 = inlined_call_operand.vmem [shape: f32[32,64], index: 4, kind: input, shape index: {}]   ;;  %s3320_s5 = inlined_call_operand.vmem [shape: f32[32,64], index: 5, kind: input, shape index: {}]   ;;  %s3321_s6 = inlined_call_operand.vmem [shape: f32[64,32], index: 6, kind: input, shape index: {}]   ;;  %s3322_s7 = inlined_call_operand.vmem [shape: f32[20,64], index: 7, kind: input, shape index: {}]   ;;  %s3323_s8 = inlined_call_operand.vmem [shape: f32[1,64], index: 8, kind: input, shape index: {}]   ;;  %s3324_s9 = inlined_call_operand.vmem [shape: f32[1,64], index: 9, kind: input, shape index: {}]   ;;  %s3325_s10 = inlined_call_operand.hbm [shape: f32[2,8,32], index: 10, kind: output, shape index: {}]  }
   0x1   :  { %3333 = sst [smem:[#allocation14_spill]] %s3315_s0 }
   0x2   :  { %15 = vsyncpa [#allocation3], 0 }
   0x3   :  { %17 = vsyncpa [#allocation3 + $0x1], 0 }
   0x4   :  { %18 = vsyncpa [#allocation6], 0 }
   0x5   :  { %20 = vsyncpa [#allocation6 + $0x1], 0 }
   0x6   :  { %21 = vsyncpa [#allocation4], 0 }
   0x7   :  { %23 = vsyncpa [#allocation4 + $0x1], 0  ;;  %s2759_s13 = smov 0   ;;  %s2761_s14 = smov 0  }
   0x8   :  { %s2763_s15 = smov 0   ;;  %s2765_s16 = smov 0  }
   0x9 LB: > { %3334 = sst [smem:[#allocation11_spill]] %s2680_s15  ;;  %s2780_s17 = sadd.s32 4294967295, %s2684_s16   ;;  %s2684_s16 = sphi %s2765_s16, %s3361_s16   ;;  %s2680_s15 = sphi %s2763_s15, %s3363_s15   ;;  %s2676_s14 = sphi %s2761_s14, %s3365_s14   ;;  %s2672_s13 = sphi %s2759_s13, %s3364_s13  }
   0xa   : > { %s2073_s18 = sadd.s32 4294967294, %s2684_s16   ;;  %s2784_s19 = sadd.s32 1, %s2684_s16  }
   0xb   : > { %3335 = sst [smem:[#allocation12_spill]] %s2784_s19  ;;  %s36_s20 = sadd.s32 1, %s2680_s15 }
   0xc   : > { %s33_s21 = ssub.s32 %s2684_s16, %s2784_s19  ;;  %p43_p0 = scmp.ne.s32.totalorder %s2680_s15, %s2676_s14 }
   0xd   : > { %p34_p1 = scmp.eq.s32.totalorder %s33_s21, 0  ;;  %p44_p2 = scmp.eq.s32.totalorder %s2684_s16, 0 }
   0xe   : > { %p49_p3 = scmp.ne.s32.totalorder %s2676_s14, %s2672_s13  ;;  %p50_p4 = scmp.eq.s32.totalorder %s2780_s17, 0 }
   0xf   : > { %s2796_s22 = scalar_select %p34_p1, %s2680_s15, %s36_s20  }
  0x10   : > { %p2798_p5 = por %p44_p2, %p43_p0  ;;  %p2802_p6 = por %p50_p4, %p49_p3 }
  0x11   : > { %3336 = sst [smem:[#allocation13_spill]] %s2796_s22  ;;  %p272_p7 = scmp.eq.s32.totalorder %s2780_s17, 1 }
  0x12   : > { %s3338_s24 = scalar_select %p2802_p6, 1, 0 }
  0x13   : > { %p278_p8 = scmp.eq.s32.totalorder %s2073_s18, 1  ;;  %p2444_p10 = scmp.lt.s32.totalorder %s2684_s16, 2 }
  0x14   : > { %p2809_p11 = por %p272_p7, %p43_p0  ;;  %s2818_s27 = sand.u32 1, %s2680_s15  }
  0x15   : > { %p2813_p12 = por %p278_p8, %p49_p3  ;;  %s3327_s28 = sshll.u32 %s2684_s16, 7 }
  0x16   : > { %s3339_s25 = scalar_select %p2809_p11, 1, 0 }
  0x17   : > { %s3340_s26 = scalar_select %p2813_p12, 1, 0 }
  0x18   : > { %s3326_s29 = sshll.u32 %s2818_s27, 3  ;;  %s3341_s0 = sld [smem:[#allocation14_spill]] }
  0x19   : > { %s323_s18 = scalar_lea.vmem [#allocation2], %s3326_s29  ;;  %p2833_p13 = pnand %p2444_p10, %p2798_p5 }
  0x1a   : > { %s330_s20 = sshll.u32 %s323_s18, 4  ;;  %s320_s30 = scalar_lea.sflag [#allocation3], %s2818_s27  ;;  %s2837_s20 = int_to_ptr.vmem [resolvable:$true] %s330_s20 }
  0x1b   : > { %p2556_p3 = pneg %p2833_p13 }
  0x1e   : > { %s2827_s12 = scalar_lea.hbm %s3341_s0, %s3327_s28  ;;  %s2559_s29 = scalar_lea.hbm %s3341_s0, 256 }
  0x1f   : > { %s2554_s11 = scalar_lea.hbm %s2827_s12, 128  ;;  %p2560_p5 = scmp.lt.u32.totalorder %s2827_s12, %s3341_s0 }
  0x20   : > { %p2555_p2 = scmp.ne.s32.totalorder %s2827_s12, %s2554_s11  ;;  %p2561_p8 = scmp.lt.u32.totalorder %s2559_s29, %s2554_s11 }
  0x21   : > { %p2563_p9 = scmp.lt.u32.totalorder %s2554_s11, %s2827_s12 }
  0x22   : > { %p2557_p4 = pnand %p2556_p3, %p2555_p2  ;;  %p2562_p10 = por %p2561_p8, %p2560_p5 }
  0x24   : > { %p2558_p7 = pneg %p2557_p4  ;;  %p2564_p0 = por %p2563_p9, %p2562_p10 }
  0x26   : > { %p2565_p1 = pnand %p2564_p0, %p2558_p7 }
  0x28   : > { %2568 = shalt.err (!%p2565_p1)
}
  0x29   : > { %s2569_s15 = scalar_lea.vmem %s2837_s20, 128  ;;  %s2686_s23 = smov [#allocation2]  }
  0x2a   : > { %p2570_p2 = scmp.ne.s32.totalorder %s2837_s20, %s2569_s15  ;;  %s2574_s18 = sshll.u32 %s2686_s23, 4  ;;  %s2575_s18 = int_to_ptr.vmem [resolvable:$false] %s2574_s18 }
  0x2b   : > { %s2576_s22 = scalar_lea.vmem %s2575_s18, 256  ;;  %p2577_p11 = scmp.lt.s32.totalorder %s2837_s20, %s2575_s18 }
  0x2c   : > { %p2572_p4 = pnand %p2570_p2, %p2556_p3  ;;  %p2578_p5 = scmp.lt.s32.totalorder %s2576_s22, %s2569_s15 }
  0x2e   : > { %p2573_p12 = pneg %p2572_p4  ;;  %p2579_p8 = por %p2578_p5, %p2577_p11 }
  0x30   : > { %p2580_p9 = pnand %p2579_p8, %p2573_p12 }
  0x32   : > { %2583 = shalt.err (!%p2580_p9)
}
  0x33   : > { %2436 = dma.hbm_to_vmem [thread:$0]  (!%p2833_p13), %s2827_s12, 128, %s2837_s20, %s320_s30  }
  0x34   : > { %p3343_p0 = scmp.lt.s32.totalorder %s2684_s16, 3  ;;  %p3344_p1 = scmp.ge.s32.totalorder %s2684_s16, 1 }
  0x35   : > { %s3346_s15 = sshll.u32 %s2684_s16, 7  ;;  %s3347_s18 = sshll.u32 %s2818_s27, 3 }
  0x36   : > { %p2871_p7 = pnand %p3344_p1, %p3343_p0  ;;  %s2880_s23 = scalar_lea.hbm %s3317_s2, %s3346_s15 }
  0x37   : > { %s349_s22 = scalar_lea.vmem [#allocation5], %s3347_s18  ;;  %s346_s12 = scalar_lea.sflag [#allocation6], %s2818_s27 }
  0x38   : > { %s3345_s28 = scalar_select %p2871_p7, 1, 0 }
  0x39   : > { %s356_s0 = sshll.u32 %s349_s22, 4  ;;  %s2584_s20 = scalar_lea.hbm %s2880_s23, 128  ;;  %s357_s0 = int_to_ptr.vmem [resolvable:$true] %s356_s0 }
  0x3a   : > { %p2585_p11 = scmp.ne.s32.totalorder %s2880_s23, %s2584_s20  ;;  %s2589_s15 = scalar_lea.hbm %s3317_s2, 256 }
  0x3b   : > { %p2590_p2 = scmp.lt.u32.totalorder %s2880_s23, %s3317_s2  ;;  %p2591_p4 = scmp.lt.u32.totalorder %s2589_s15, %s2584_s20 }
  0x3c   : > { %p2587_p12 = pnand %p2585_p11, %p2556_p3  ;;  %p2593_p8 = scmp.lt.u32.totalorder %s2584_s20, %s2880_s23 }
  0x3d   : > { %p2592_p5 = por %p2591_p4, %p2590_p2 }
  0x3e   : > { %p2588_p10 = pneg %p2587_p12 }
  0x3f   : > { %p2594_p9 = por %p2593_p8, %p2592_p5 }
  0x41   : > { %p2595_p0 = pnand %p2594_p9, %p2588_p10 }
  0x43   : > { %2598 = shalt.err (!%p2595_p0)
}
  0x44   : > { %s2599_s27 = scalar_lea.vmem %s357_s0, 128  ;;  %s2687_s18 = smov [#allocation5]  }
  0x45   : > { %p2600_p1 = scmp.ne.s32.totalorder %s357_s0, %s2599_s27  ;;  %s2604_s19 = sshll.u32 %s2687_s18, 4  ;;  %s2605_s19 = int_to_ptr.vmem [resolvable:$false] %s2604_s19 }
  0x46   : > { %s2606_s22 = scalar_lea.vmem %s2605_s19, 256  ;;  %p2607_p6 = scmp.lt.s32.totalorder %s357_s0, %s2605_s19 }
  0x47   : > { %p2602_p11 = pnand %p2600_p1, %p2556_p3  ;;  %p2608_p7 = scmp.lt.s32.totalorder %s2606_s22, %s2599_s27 }
  0x49   : > { %p2603_p12 = pneg %p2602_p11  ;;  %p2609_p2 = por %p2608_p7, %p2607_p6 }
  0x4b   : > { %p2610_p4 = pnand %p2609_p2, %p2603_p12 }
  0x4d   : > { %2613 = shalt.err (!%p2610_p4)
}
  0x4e   : > { %2439 = dma.hbm_to_vmem [thread:$0]  (!%p2833_p13), %s2880_s23, 128, %s357_s0, %s346_s12  }
  0x4f   : > { %p3348_p10 = scmp.ne.s32.totalorder %s3345_s28, 0 }
  0x50   : > { %s2907_s20 = sand.u32 (!%p3348_p10), 1, %s2676_s14   ;;  %p3349_p6 = scmp.ne.s32.totalorder (!%p3348_p10), %s3338_s24, 0 }
  0x51   : > { %365 = sbr.rel (%p3348_p10) target bundleno = 2747 (0xabb), region = 60  ;;  %s2910_s30 = sshll.u32 (!%p3348_p10), %s2907_s20, 3 }
  0x52   : > { %s368_s15 = scalar_lea.sflag (!%p3348_p10), [#allocation3], %s2907_s20 }
  0x58   : > { %2659 = dma.done.wait (%p3349_p6), %s368_s15, 128  }
  0x59   : > { %2661 = vsyncadd (%p3349_p6), %s368_s15, 4294967168  ;;  %s377_s0 = scalar_lea.sflag [#allocation6], %s2907_s20 }
  0x5a   : > { %2663 = dma.done.wait (%p3349_p6), %s377_s0, 128  }
  0x5b   : > { %2665 = vsyncadd (%p3349_p6), %s377_s0, 4294967168  ;;  %p427_p13 = scmp.lt.s32.totalorder %s2780_s17, 1  ;;  %v2688_v0 = vmov 0.0|0.0   ;;  %vm2689_vm0 = vmmov 0   ;;  %v2690_v1 = vmov 0.0   ;;  %v436_v2 = vld [vmem:[%s3318_s3] sm:$0xff]  ;;  %v697_v51 = vlaneseq }
  0x5c   : > { %2345 = vmatprep.subr.bf16.mxu1 %v2688_v0  ;;  %2209 = vmatprep.mubr.msk.f32.mxu1 %vm2689_vm0, %v2690_v1  ;;  %v437_v3 = vld [vmem:[%s3318_s3 + $0x8] sm:$0xff]  ;;  %v438_v4 = vld [vmem:[%s3318_s3 + $0x10] sm:$0xff]  ;;  %v439_v6 = vld [vmem:[%s3318_s3 + $0x18] sm:$0xff]  ;;  %vm440_vm1 = vcmask 261120   ;;  %vm708_vm2 = vcmask 130048   ;;  %s2691_s22 = smov 112  }
  0x5d   : > { %s428_s28 = scalar_select %p427_p13, %s2780_s17, 1  ;;  %v2346_v5 = vpack.c.bf16 %v437_v3, %v436_v2  ;;  %v514_v7 = vld [vmem:[%s3319_s4] sm:$0xff]  ;;  %v515_v8 = vld [vmem:[%s3319_s4 + $0x8] sm:$0xff]  ;;  %v2349_v9 = vpack.c.bf16 %v439_v6, %v438_v4  ;;  %v516_v14 = vld [vmem:[%s3319_s4 + $0x10] sm:$0xff]  ;;  %v698_v52 = vshrl.u32 %v697_v51, 7  ;;  %vm798_vm4 = vcmask 154624  }
  0x5e   : > { %v2351_v11 = vpack.c.bf16 %v515_v8, %v514_v7  ;;  %v599_v12 = vld [vmem:[%s3320_s5] sm:$0xff]  ;;  %v600_v13 = vld [vmem:[%s3320_s5 + $0x8] sm:$0xff]  ;;  %v517_v15 = vld [vmem:[%s3319_s4 + $0x18] sm:$0xff]  ;;  %s2692_s27 = smov 127   ;;  %s2695_s24 = smov 126   ;;  %vm915_vm6 = vcmask 1043456  }
  0x5f   : > { %s2134_s23 = sshll.u32 %s428_s28, 4  ;;  %2347 = vmatpush3.bf16.msra.mxu1 %v2346_v5  ;;  %v2359_v16 = vpack.c.bf16 %v600_v13, %v599_v12  ;;  %s3350_s28 = scalar_lea.vmem [#allocation2], %s2910_s30  ;;  %v2355_v18 = vpack.c.bf16 %v517_v15, %v516_v14  ;;  %v678_v20 = vld [vmem:[%s3322_s7] sm:$0xff]  ;;  %v679_v21 = vld [vmem:[%s3322_s7 + $0x8] sm:$0xff]  ;;  %vm2980_vm3 = vmpackc.low %vm708_vm2, %vm708_vm2  ;;  %v699_v53 = vsub.s32 7, %v698_v52  ;;  %vm2696_vm7 = vmmov 1  }
  0x60   : > { %s431_s0 = scalar_lea.vmem %s3316_s1, %s2134_s23  ;;  %2348 = vmatprep.subr.bf16.mxu1 %v2688_v0  ;;  %v432_v17 = vld [vmem:[%s3350_s28] sm:$0xff]  ;;  %v2368_v22 = vpack.c.bf16 %v679_v21, %v678_v20  ;;  %v2990_v24 = vld [vmem:[%s3322_s7 + $0x10] sm:$0xf]  ;;  %v602_v26 = vld [vmem:[%s3320_s5 + $0x18] sm:$0xff]  ;;  %v3005_v28 = vpack.i.bf16 %v679_v21, %v678_v20  ;;  %s2693_s23 = smov 19   ;;  %vm808_vm9 = vcmask 146432  }
  0x61   : > { %v433_v10 = vld [vmem:[%s431_s0] sm:$0xff]  ;;  %2360 = vmatprep.subr.bf16.mxu0 %v2359_v16  ;;  %v434_v19 = vld [vmem:[%s431_s0 + $0x8] sm:$0xf]  ;;  %v601_v25 = vld [vmem:[%s3320_s5 + $0x10] sm:$0xff]  ;;  %v700_v54 = vand.u32 1, %v699_v53  ;;  %s2694_s0 = smov 18  }
  0x62   : > { %2231 = vmatprep.mubr.msk.f32.mxu0 %vm440_vm1, %v433_v10  ;;  %2362 = vmatpush3.bf16.msra.mxu0 %v2359_v16  ;;  %v2363_v27 = vpack.c.bf16 %v602_v26, %v601_v25  ;;  %v2092_v29 = vld [vmem:[%s3324_s9] ss:$0 sm:$0xff]  ;;  %vm3055_vm8 = vmpackc.low %vm915_vm6, %vm2696_vm7  ;;  %v702_v63 = vshra.s32 %v699_v53, 1  ;;  %s2697_s29 = smov 16   ;;  %s2698_s21 = smov 124   ;;  %vm900_vm12 = vcmask 97280  }
  0x63   : > { %2350 = vmatpush3.bf16.msra.mxu1 %v2349_v9  ;;  %2494 = vrot.lane.b32.xlu1 %v3005_v28, %s2691_s22  ;;  %v2091_v36 = vld [vmem:[%s3323_s8] ss:$0 sm:$0xff]  ;;  %vm3043_vm5 = vcmp.eq.s32.totalorder %v700_v54, 1  ;;  %s2699_s18 = smov 96   ;;  %v705_v9 = vshra.s32 %v699_v53, 2  ;;  %s3357_s19 = scalar_lea.vmem [#allocation5], %s2910_s30 }
  0x64   : > { %2352 = vmatprep.subr.bf16.mxu1 %v2351_v11  ;;  %2364 = vmatprep.subr.bf16.mxu0 %v2363_v27  ;;  %v3064_v2 = vand.u32 1, %v702_v63  ;;  %v3092_v15 = vld [vmem:[%s3357_s19] sm:$0xff]  ;;  %s2700_s15 = smov 80   ;;  %vm1869_vm13 = vcmask 392192   ;;  %vm1879_vm14 = vcmask 523264   ;;  %s1955_s19 = scalar_lea.sflag [#allocation4], %s2907_s20 }
  0x65   : > { %p3358_p7 = scmp.ne.s32.totalorder %s3339_s25, 0 }
  0x66   : > { %2210 = vmatmul.mubr.msk.f32.vlgmr.msra.gmra.mrb[0].mxu1 %vm440_vm1, %v432_v17  ;;  %2366 = vmatpush3.bf16.msra.mxu0 %v2363_v27  ;;  %vm704_vm10 = vcmp.eq.s32.totalorder %v3064_v2, 1 }
  0x67   : > { %2354 = vmatpush3.bf16.msra.mxu1 %v2351_v11  ;;  %2220 = vmatprep.mubr.msk.f32.mxu1 %vm440_vm1, %v433_v10  ;;  %v3082_v10 = vand.u32 1, %v705_v9 }
  0x68   : > { %2356 = vmatprep.subr.bf16.mxu1 %v2355_v18  ;;  %2371 = vmatprep.subr.bf16.mxu0 %v2688_v0 }
  0x69   : > { %2232 = vmatmul.mubr.msk.f32.vlgmr.msra.gmra.mrb[0].mxu0 %vm440_vm1, %v434_v19  ;;  %996 = vrot.lane.b32.xlu1 %v2990_v24, %s2691_s22  ;;  %vm707_vm11 = vcmp.eq.s32.totalorder %v3082_v10, 1 }
  0x6a   : > { %2247 = vmatprep.mubr.msk.f32.mxu0 %vm2689_vm0, %v2690_v1 }
  0x6b   : > { %2358 = vmatpush3.bf16.msra.mxu1 %v2355_v18 }
  0x6c   : > { %2367 = vmatprep.subr.bf16.mxu1 %v2688_v0 }
  0x6e   : > { %2221 = vmatmul.mubr.msk.f32.vlgmr.msra.gmra.mrb[2].mxu1 %vm440_vm1, %v434_v19 }
  0x6f   : > { %2240 = vmatprep.mubr.msk.f32.mxu1 %vm2689_vm0, %v2690_v1 }
  0x74   : > { %2370 = vmatpush3.bf16.xpose.msk.msra.mxu1 %vm2980_vm3, %v2368_v22 }
  0x75   : > { %2238 = vmatprep.subr.mxu1 %v2690_v1 }
  0x7c   : > { %2239 = vmatpush3.xpose.msk.msra.mxu1 %vm708_vm2, %v2990_v24 }
  0x7d   : > { %2375 = vmatprep.subr.bf16.mxu1 %v2688_v0 }
  0xd5   : > { %v2495_v42 = vpop.permute.xlu1 %2494 }
  0xd6   : > { %v2497_v43 = vunpack.i.h.bf16 %v2495_v42  ;;  %v2496_v44 = vunpack.i.l.bf16 %v2495_v42 }
  0xd8   : > { %v2380_v45 = vpack.c.bf16 %v2497_v43, %v2496_v44 }
  0xdb   : > { %v997_v46 = vpop.permute.xlu1 %996 }
 0x139   : > { %v510_v30 = vpop.f32.mrb[0].mxu1 }
 0x13a   : > { %v3014_v31 = vadd.f32 %v2092_v29, %v510_v30  ;;  %v2211_v32 = vpop.f32.mrb[1].mxu1  ;;  %v3026_v37 = vadd.f32 %v2091_v36, %v510_v30 }
 0x13c   : > { %2241 = vmatmul.mubr.msk.f32.vlgmr.msra.gmra.mrb[4].mxu1 %vm708_vm2, %v3014_v31  ;;  %v2233_v39 = vpop.f32.mrb[0].mxu0 }
 0x13d   : > { %2254 = vmatprep.mubr.msk.f32.mxu1 %vm2689_vm0, %v2690_v1  ;;  %v669_v40 = vpop.f32.mrb[1].mxu0 }
 0x13e   : > { %v2376_v41 = vpack.c.bf16 %v2233_v39, %v669_v40  ;;  %v3061_v62 = vpack.i.bf16 %v2233_v39, %v669_v40 }
 0x140   : > { %2378 = vmatpush3.bf16.msk.msra.mxu1 %vm3055_vm8, %v2376_v41 }
 0x141   : > { %v2222_v33 = vpop.f32.mrb[2].mxu1  ;;  %2383 = vmatprep.subr.bf16.mxu1 %v2688_v0 }
 0x142   : > { %v590_v34 = vpop.f32.mrb[3].mxu1 }
 0x143   : > { %v2372_v35 = vpack.c.bf16 %v2222_v33, %v590_v34  ;;  %v3032_v38 = vpack.i.bf16 %v2222_v33, %v590_v34 }
 0x145   : > { %2374 = vmatpush3.bf16.xpose.msk.msra.mxu0 %vm2980_vm3, %v2372_v35 }
 0x146   : > { %2379 = vmatprep.subr.bf16.mxu0 %v2688_v0 }
 0x14c   : > { %2248 = vmatmul.mubr.msk.f32.vlgmr.msra.gmra.mrb[2].mxu0 %vm708_vm2, %v3026_v37 }
 0x14d   : > { %2263 = vmatprep.mubr.msk.f32.mxu0 %vm2689_vm0, %v2690_v1  ;;  %2382 = vmatpush3.bf16.xpose.msk.msra.mxu0 %vm2980_vm3, %v2380_v45 }
 0x14e   : > { %2261 = vmatprep.subr.mxu0 %v2690_v1 }
 0x155   : > { %2262 = vmatpush3.xpose.msk.msra.mxu0 %vm708_vm2, %v997_v46 }
 0x156   : > { %2391 = vmatprep.subr.bf16.mxu0 %v2688_v0 }
 0x20f   : > { %v787_v47 = vpop.f32.mrb[4].mxu1 }
 0x210   : > { %792 = vrot.lane.b32.xlu0 %v787_v47, %s2692_s27  ;;  %v2242_v48 = vpop.f32.mrb[5].mxu1 }
 0x214   : > { %795 = vrot.lane.b32.xlu0 %v787_v47, %s2693_s23 }
 0x218   : > { %990 = vrot.lane.b32.xlu0 %v3014_v31, %s2691_s22 }
 0x21f   : > { %v895_v49 = vpop.f32.mrb[2].mxu0 }
 0x220   : > { %v2249_v50 = vpop.f32.mrb[3].mxu0 }
 0x282   : > { %v793_v55 = vpop.permute.xlu0 %792 }
 0x286   : > { %v796_v57 = vpop.permute.xlu0 %795 }
 0x287   : > { %v799_v58 = vsel %vm798_vm4, %v793_v55, %v796_v57 }
 0x288   : > { %v800_v59 = vsel %vm3043_vm5, %v799_v58, %v787_v47 }
 0x289   : > { %805 = vrot.lane.b32.xlu0 %v800_v59, %s2694_s0  ;;  %802 = vrot.lane.b32.xlu1 %v800_v59, %s2695_s24 }
 0x28a   : > { %v991_v60 = vpop.permute.xlu0 %990 }
 0x28b   : > { %2264 = vmatmul.mubr.msk.f32.vlgmr.msra.gmra.mrb[4].mxu0 %vm708_vm2, %v991_v60 }
 0x28c   : > { %2286 = vmatprep.mubr.msk.f32.mxu0 %vm2689_vm0, %v2690_v1 }
 0x2fb   : > { %v803_v3 = vpop.permute.xlu1 %802  ;;  %v806_v4 = vpop.permute.xlu0 %805 }
 0x2fc   : > { %v809_v5 = vsel %vm808_vm9, %v803_v3, %v806_v4 }
 0x2fd   : > { %v810_v6 = vsel %vm704_vm10, %v809_v5, %v800_v59 }
 0x2fe   : > { %815 = vrot.lane.b32.xlu0 %v810_v6, %s2697_s29  ;;  %812 = vrot.lane.b32.xlu1 %v810_v6, %s2698_s21 }
 0x302   : > { %2499 = vrot.lane.b32.xlu0 %v3032_v38, %s2691_s22 }
 0x306   : > { %1103 = vrot.lane.b32.xlu0 %v3026_v37, %s2691_s22 }
 0x35e   : > { %v1072_v7 = vpop.f32.mrb[4].mxu0 }
 0x35f   : > { %v2265_v8 = vpop.f32.mrb[5].mxu0  ;;  %1077 = vrot.lane.b32.xlu0 %v1072_v7, %s2692_s27 }
 0x363   : > { %1080 = vrot.lane.b32.xlu0 %v1072_v7, %s2693_s23 }
 0x367   : > { %2504 = vrot.lane.b32.xlu0 %v3005_v28, %s2699_s18 }
 0x36b   : > { %1285 = vrot.lane.b32.xlu0 %v2990_v24, %s2699_s18 }
 0x36f   : > { %1279 = vrot.lane.b32.xlu0 %v3014_v31, %s2699_s18 }
 0x370   : > { %v816_v11 = vpop.permute.xlu0 %815  ;;  %v813_v12 = vpop.permute.xlu1 %812 }
 0x371   : > { %v818_v13 = vsel %vm708_vm2, %v813_v12, %v816_v11 }
 0x372   : > { %v819_v14 = vsel %vm707_vm11, %v818_v13, %v810_v6 }
 0x373   : > { %v896_v16 = vadd.f32 %v895_v49, %v819_v14 }
 0x374   : > { %v2500_v19 = vpop.permute.xlu0 %2499 }
 0x375   : > { %v899_v17 = vadd.f32 %v896_v16, %v3092_v15  ;;  %v2502_v40 = vunpack.i.h.bf16 %v2500_v19  ;;  %v2501_v41 = vunpack.i.l.bf16 %v2500_v19 }
 0x377   : > { %v901_v18 = vsel %vm900_vm12, %v899_v17, -inf  ;;  %v2384_v43 = vpack.c.bf16 %v2502_v40, %v2501_v41 }
 0x378   : > { %902 = vmax.xlane.f32.xlu1 %v901_v18  ;;  %v1104_v20 = vpop.permute.xlu0 %1103 }
 0x3d1   : > { %v1078_v21 = vpop.permute.xlu0 %1077 }
 0x3d5   : > { %v1081_v22 = vpop.permute.xlu0 %1080 }
 0x3d6   : > { %v1083_v25 = vsel %vm798_vm4, %v1078_v21, %v1081_v22 }
 0x3d7   : > { %v1084_v26 = vsel %vm3043_vm5, %v1083_v25, %v1072_v7 }
 0x3d8   : > { %1086 = vrot.lane.b32.xlu0 %v1084_v26, %s2695_s24 }
 0x3d9   : > { %v2505_v27 = vpop.permute.xlu0 %2504 }
 0x3da   : > { %v2507_v29 = vunpack.i.h.bf16 %v2505_v27  ;;  %v2506_v30 = vunpack.i.l.bf16 %v2505_v27 }
 0x3dc   : > { %v2392_v32 = vpack.c.bf16 %v2507_v29, %v2506_v30  ;;  %1089 = vrot.lane.b32.xlu0 %v1084_v26, %s2694_s0 }
 0x3dd   : > { %v1286_v33 = vpop.permute.xlu0 %1285 }
 0x3de   : > { %2394 = vmatpush3.bf16.xpose.msk.msra.mxu0 %vm2980_vm3, %v2392_v32 }
 0x3df   : > { %2284 = vmatprep.subr.mxu0 %v2690_v1 }
 0x3e1   : > { %v1280_v34 = vpop.permute.xlu0 %1279 }
 0x3e6   : > { %2285 = vmatpush3.xpose.msk.msra.mxu0 %vm708_vm2, %v1286_v33 }
 0x3e7   : > { %2403 = vmatprep.subr.bf16.mxu0 %v2688_v0 }
 0x3e9   : > { %2287 = vmatmul.mubr.msk.f32.vlgmr.msra.gmra.mrb[6].mxu0 %vm708_vm2, %v1280_v34 }
 0x3ea   : > { %2309 = vmatprep.mubr.msk.f32.mxu0 %vm2689_vm0, %v2690_v1 }
 0x405   : > { %v903_v35 = vpop.xlane.xlu1 %902 }
 0x406   : > { %v904_v36 = vsub.f32 %v899_v17, %v903_v35 }
 0x408   : > { %v905_v39 = vmul.f32 1.442695, %v904_v36 }
 0x40a   : > { %2538 = vpow2.f32 %v905_v39 }
 0x414   : > { %v3109_v42 = vpop.eup %2538 }
 0x415   : > { %2255 = vmatmul.mubr.msk.f32.vlgmr.msra.gmra.mrb[6].mxu1 %vm900_vm12, %v3109_v42 }
 0x416   : > { %2386 = vmatpush3.bf16.xpose.msk.msra.mxu1 %vm2980_vm3, %v2384_v43  ;;  %2270 = vmatprep.mubr.msk.f32.mxu1 %vm2689_vm0, %v2690_v1 }
 0x417   : > { %2387 = vmatprep.subr.bf16.mxu1 %v2688_v0 }
 0x41d   : > { %2271 = vmatmul.mubr.msk.f32.vlgmr.msra.gmra.mrb[8].mxu1 %vm708_vm2, %v1104_v20 }
 0x41e   : > { %2277 = vmatprep.mubr.msk.f32.mxu1 %vm2689_vm0, %v2690_v1 }
 0x44a   : > { %v1087_v44 = vpop.permute.xlu0 %1086 }
 0x44e   : > { %v1090_v45 = vpop.permute.xlu0 %1089 }
 0x44f   : > { %v1092_v46 = vsel %vm808_vm9, %v1087_v44, %v1090_v45 }
 0x450   : > { %v1093_v47 = vsel %vm704_vm10, %v1092_v46, %v1084_v26 }
 0x451   : > { %1098 = vrot.lane.b32.xlu0 %v1093_v47, %s2697_s29  ;;  %1095 = vrot.lane.b32.xlu1 %v1093_v47, %s2698_s21 }
 0x455   : > { %2509 = vrot.lane.b32.xlu1 %v3061_v62, %s2691_s22  ;;  %s2701_s22 = smov 32  }
 0x459   : > { %2514 = vrot.lane.b32.xlu1 %v3032_v38, %s2699_s18 }
 0x45d   : > { %1392 = vrot.lane.b32.xlu1 %v3026_v37, %s2699_s18 }
 0x4bc   : > { %v1361_v48 = vpop.f32.mrb[6].mxu0 }
 0x4bd   : > { %v2288_v49 = vpop.f32.mrb[7].mxu0  ;;  %1366 = vrot.lane.b32.xlu1 %v1361_v48, %s2692_s27 }
 0x4c1   : > { %1369 = vrot.lane.b32.xlu1 %v1361_v48, %s2693_s23 }
 0x4c3   : > { %v1096_v50 = vpop.permute.xlu1 %1095  ;;  %v1099_v58 = vpop.permute.xlu0 %1098 }
 0x4c4   : > { %v1101_v59 = vsel %vm708_vm2, %v1096_v50, %v1099_v58 }
 0x4c5   : > { %2519 = vrot.lane.b32.xlu1 %v3005_v28, %s2700_s15  ;;  %v1102_v28 = vsel %vm707_vm11, %v1101_v59, %v1093_v47 }
 0x4c7   : > { %v2510_v51 = vpop.permute.xlu1 %2509 }
 0x4c8   : > { %v2512_v52 = vunpack.i.h.bf16 %v2510_v51  ;;  %v2511_v53 = vunpack.i.l.bf16 %v2510_v51 }
 0x4c9   : > { %1567 = vrot.lane.b32.xlu1 %v3014_v31, %s2700_s15 }
 0x4ca   : > { %v2388_v54 = vpack.c.bf16 %v2512_v52, %v2511_v53 }
 0x4cb   : > { %v2515_v5 = vpop.permute.xlu1 %2514 }
 0x4cc   : > { %2390 = vmatpush3.bf16.msk.msra.mxu1 %vm3055_vm8, %v2388_v54  ;;  %v2517_v21 = vunpack.i.h.bf16 %v2515_v5  ;;  %v2516_v22 = vunpack.i.l.bf16 %v2515_v5 }
 0x4cd   : > { %2395 = vmatprep.subr.bf16.mxu1 %v2688_v0 }
 0x4ce   : > { %v2396_v26 = vpack.c.bf16 %v2517_v21, %v2516_v22 }
 0x4cf   : > { %v1393_v6 = vpop.permute.xlu1 %1392 }
 0x4e8   : > { %v3141_v55 = vpop.f32.mrb[6].mxu1 }
 0x4e9   : > { %v2256_v57 = vpop.f32.mrb[7].mxu1 }
 0x4f0   : > { %v1181_v60 = vpop.f32.mrb[8].mxu1 }
 0x4f1   : > { %v1182_v63 = vadd.f32 %v1181_v60, %v1102_v28  ;;  %v2272_v3 = vpop.f32.mrb[9].mxu1 }
 0x4f3   : > { %v1185_v31 = vadd.f32 %v1182_v63, %v3092_v15 }
 0x4f5   : > { %v1186_v4 = vsel %vm900_vm12, %v1185_v31, -inf }
 0x4f6   : > { %1187 = vmax.xlane.f32.xlu0 %v1186_v4 }
 0x50c   : > { %1573 = vrot.lane.b32.xlu0 %v2990_v24, %s2700_s15 }
 0x52f   : > { %v1367_v7 = vpop.permute.xlu1 %1366 }
 0x533   : > { %v1370_v8 = vpop.permute.xlu1 %1369 }
 0x534   : > { %v1372_v9 = vsel %vm798_vm4, %v1367_v7, %v1370_v8 }
 0x535   : > { %v1373_v11 = vsel %vm3043_vm5, %v1372_v9, %v1361_v48 }
 0x536   : > { %1375 = vrot.lane.b32.xlu1 %v1373_v11, %s2695_s24 }
 0x537   : > { %v2520_v12 = vpop.permute.xlu1 %2519 }
 0x538   : > { %v2522_v13 = vunpack.i.h.bf16 %v2520_v12  ;;  %v2521_v14 = vunpack.i.l.bf16 %v2520_v12 }
 0x53a   : > { %v2404_v16 = vpack.c.bf16 %v2522_v13, %v2521_v14  ;;  %1378 = vrot.lane.b32.xlu1 %v1373_v11, %s2694_s0 }
 0x53b   : > { %v1568_v20 = vpop.permute.xlu1 %1567 }
 0x53c   : > { %2406 = vmatpush3.bf16.xpose.msk.msra.mxu0 %vm2980_vm3, %v2404_v16 }
 0x53d   : > { %2307 = vmatprep.subr.mxu0 %v2690_v1 }
 0x583   : > { %v1188_v24 = vpop.xlane.xlu0 %1187 }
 0x584   : > { %v1189_v17 = vsub.f32 %v1185_v31, %v1188_v24 }
 0x586   : > { %v1190_v18 = vmul.f32 1.442695, %v1189_v17 }
 0x587   : > { %v1574_v19 = vpop.permute.xlu0 %1573 }
 0x588   : > { %2540 = vpow2.f32 %v1190_v18  ;;  %2308 = vmatpush3.xpose.msk.msra.mxu0 %vm708_vm2, %v1574_v19 }
 0x589   : > { %2415 = vmatprep.subr.bf16.mxu0 %v2688_v0 }
 0x58b   : > { %2310 = vmatmul.mubr.msk.f32.vlgmr.msra.gmra.mrb[8].mxu0 %vm708_vm2, %v1568_v20 }
 0x58c   : > { %2342 = vmatprep.mubr.msk.f32.mxu0 %vm2689_vm0, %v2690_v1 }
 0x592   : > { %v3163_v25 = vpop.eup %2540 }
 0x593   : > { %2278 = vmatmul.mubr.msk.f32.vlgmr.msra.gmra.mrb[10].mxu1 %vm900_vm12, %v3163_v25  ;;  %v1192_v23 = vsel %vm900_vm12, %v3163_v25, 0.0 }
 0x594   : > { %2398 = vmatpush3.bf16.xpose.msk.msra.mxu1 %vm2980_vm3, %v2396_v26  ;;  %2293 = vmatprep.mubr.msk.f32.mxu1 %vm2689_vm0, %v2690_v1 }
 0x595   : > { %2399 = vmatprep.subr.bf16.mxu1 %v2688_v0 }
 0x59b   : > { %2294 = vmatmul.mubr.msk.f32.vlgmr.msra.gmra.mrb[12].mxu1 %vm708_vm2, %v1393_v6 }
 0x59c   : > { %2300 = vmatprep.mubr.msk.f32.mxu1 %vm2689_vm0, %v2690_v1 }
 0x5a8   : > { %v1376_v27 = vpop.permute.xlu1 %1375 }
 0x5ac   : > { %v1379_v29 = vpop.permute.xlu1 %1378 }
 0x5ad   : > { %v1381_v30 = vsel %vm808_vm9, %v1376_v27, %v1379_v29 }
 0x5ae   : > { %v1382_v32 = vsel %vm704_vm10, %v1381_v30, %v1373_v11 }
 0x5af   : > { %1384 = vrot.lane.b32.xlu1 %v1382_v32, %s2698_s21 }
 0x5b3   : > { %1387 = vrot.lane.b32.xlu1 %v1382_v32, %s2697_s29 }
 0x5b7   : > { %2524 = vrot.lane.b32.xlu1 %v3061_v62, %s2699_s18 }
 0x5bb   : > { %2529 = vrot.lane.b32.xlu1 %v3032_v38, %s2700_s15 }
 0x5bf   : > { %1680 = vrot.lane.b32.xlu1 %v3026_v37, %s2700_s15 }
 0x621   : > { %v1385_v33 = vpop.permute.xlu1 %1384 }
 0x625   : > { %v1388_v34 = vpop.permute.xlu1 %1387 }
 0x626   : > { %v1390_v35 = vsel %vm708_vm2, %v1385_v33, %v1388_v34 }
 0x627   : > { %v1391_v45 = vsel %vm707_vm11, %v1390_v35, %v1382_v32  ;;  %v907_v32 = vsel %vm900_vm12, %v3109_v42, 0.0  ;;  %v1871_v35 = vld [vmem:[%s3321_s6] sm:$0xff] }
 0x629   : > { %v2525_v36 = vpop.permute.xlu1 %2524 }
 0x62a   : > { %v2527_v39 = vunpack.i.h.bf16 %v2525_v36  ;;  %v2526_v40 = vunpack.i.l.bf16 %v2525_v36  ;;  %v1872_v36 = vld [vmem:[%s3321_s6 + $0x8] sm:$0xff] }
 0x62b   : > { %v2416_v42 = vpack.c.bf16 %v1872_v36, %v1871_v35 }
 0x62c   : > { %v2400_v41 = vpack.c.bf16 %v2527_v39, %v2526_v40  ;;  %v1873_v39 = vld [vmem:[%s3321_s6 + $0x10] sm:$0xff]  ;;  %v1874_v40 = vld [vmem:[%s3321_s6 + $0x18] sm:$0xff] }
 0x62d   : > { %v2530_v51 = vpop.permute.xlu1 %2529  ;;  %2417 = vmatpush3.bf16.msra.mxu0 %v2416_v42 }
 0x62e   : > { %2402 = vmatpush3.bf16.msk.msra.mxu1 %vm3055_vm8, %v2400_v41  ;;  %v2532_v63 = vunpack.i.h.bf16 %v2530_v51  ;;  %v2531_v3 = vunpack.i.l.bf16 %v2530_v51  ;;  %v2419_v41 = vpack.c.bf16 %v1874_v40, %v1873_v39  ;;  %2418 = vmatprep.subr.bf16.mxu0 %v2688_v0 }
 0x62f   : > { %2407 = vmatprep.subr.bf16.mxu1 %v2688_v0 }
 0x630   : > { %v2408_v4 = vpack.c.bf16 %v2532_v63, %v2531_v3 }
 0x631   : > { %v1681_v52 = vpop.permute.xlu1 %1680  ;;  %2420 = vmatpush3.bf16.msra.mxu0 %v2419_v41 }
 0x632   : > { %2421 = vmatprep.subr.bf16.mxu0 %v2688_v0 }
 0x65e   : > { %v1649_v43 = vpop.f32.mrb[8].mxu0 }
 0x65f   : > { %1654 = vrot.lane.b32.xlu1 %v1649_v43, %s2692_s27  ;;  %v2311_v38 = vpop.f32.mrb[9].mxu0  ;;  %s2702_s27 = smov 48  }
 0x660   : > { %v1876_v38 = vld [vmem:[%s3321_s6 + $0x28] sm:$0xff] }
 0x663   : > { %1657 = vrot.lane.b32.xlu1 %v1649_v43, %s2693_s23  ;;  %s2131_s23 = sshll.u32 %s2780_s17, 7  ;;  %s2703_s17 = smov [#allocation7]  }
 0x664   : > { %s3270_s18 = scalar_lea.hbm %s3325_s10, %s2131_s23 }
 0x666   : > { %v3192_v37 = vpop.f32.mrb[10].mxu1 }
 0x667   : > { %v2279_v44 = vpop.f32.mrb[11].mxu1 }
 0x668   : > { %v1877_v44 = vld [vmem:[%s3321_s6 + $0x30] sm:$0xff] }
 0x66e   : > { %v1470_v46 = vpop.f32.mrb[12].mxu1 }
 0x66f   : > { %v1471_v47 = vadd.f32 %v1470_v46, %v1391_v45  ;;  %v2295_v48 = vpop.f32.mrb[13].mxu1  ;;  %v1878_v45 = vld [vmem:[%s3321_s6 + $0x38] sm:$0xff] }
 0x670   : > { %v2425_v46 = vpack.c.bf16 %v1878_v45, %v1877_v44 }
 0x671   : > { %v1474_v49 = vadd.f32 %v1471_v47, %v3092_v15 }
 0x673   : > { %v1475_v50 = vsel %vm900_vm12, %v1474_v49, -inf }
 0x674   : > { %1476 = vmax.xlane.f32.xlu0 %v1475_v50 }
 0x6d1   : > { %v1655_v53 = vpop.permute.xlu1 %1654 }
 0x6d5   : > { %v1658_v54 = vpop.permute.xlu1 %1657 }
 0x6d6   : > { %v1660_v57 = vsel %vm798_vm4, %v1655_v53, %v1658_v54 }
 0x6d7   : > { %v1661_v58 = vsel %vm3043_vm5, %v1660_v57, %v1649_v43  ;;  %v1875_v43 = vld [vmem:[%s3321_s6 + $0x20] sm:$0xff] }
 0x6d8   : > { %1663 = vrot.lane.b32.xlu1 %v1661_v58, %s2695_s24 }
 0x6dc   : > { %1666 = vrot.lane.b32.xlu1 %v1661_v58, %s2694_s0  ;;  %s426_s0 = scalar_lea.vmem [#allocation7], %s2910_s30  ;;  %s2618_s30 = sshll.u32 %s2703_s17, 4  ;;  %s2619_s30 = int_to_ptr.vmem [resolvable:$false] %s2618_s30 }
 0x6dd   : > { %s1968_s24 = sshll.u32 %s426_s0, 4  ;;  %s3272_s24 = int_to_ptr.vmem [resolvable:$true] %s1968_s24 }
 0x6de   : > { %p2621_p9 = scmp.lt.s32.totalorder %s3272_s24, %s2619_s30 }
 0x701   : > { %v1477_v59 = vpop.xlane.xlu0 %1476 }
 0x702   : > { %v1478_v28 = vsub.f32 %v1474_v49, %v1477_v59 }
 0x704   : > { %v1479_v60 = vmul.f32 1.442695, %v1478_v28 }
 0x706   : > { %2542 = vpow2.f32 %v1479_v60 }
 0x710   : > { %v2543_v31 = vpop.eup %2542 }
 0x711   : > { %2301 = vmatmul.mubr.msk.f32.vlgmr.msra.gmra.mrb[14].mxu1 %vm900_vm12, %v2543_v31  ;;  %v1481_v21 = vsel %vm900_vm12, %v2543_v31, 0.0 }
 0x712   : > { %2410 = vmatpush3.bf16.xpose.msk.msra.mxu1 %vm2980_vm3, %v2408_v4  ;;  %2316 = vmatprep.mubr.msk.f32.mxu1 %vm2689_vm0, %v2690_v1 }
 0x713   : > { %2411 = vmatprep.subr.bf16.mxu1 %v2688_v0 }
 0x719   : > { %2317 = vmatmul.mubr.msk.f32.vlgmr.msra.gmra.mrb[16].mxu1 %vm708_vm2, %v1681_v52 }
 0x71a   : > { %2323 = vmatprep.mubr.msk.f32.mxu1 %vm2689_vm0, %v2690_v1 }
 0x74a   : > { %v1664_v56 = vpop.permute.xlu1 %1663 }
 0x74e   : > { %v1667_v5 = vpop.permute.xlu1 %1666 }
 0x74f   : > { %v1669_v6 = vsel %vm808_vm9, %v1664_v56, %v1667_v5 }
 0x750   : > { %v1670_v7 = vsel %vm704_vm10, %v1669_v6, %v1661_v58 }
 0x751   : > { %1672 = vrot.lane.b32.xlu1 %v1670_v7, %s2698_s21  ;;  %1675 = vrot.lane.b32.xlu0 %v1670_v7, %s2697_s29 }
 0x755   : > { %2534 = vrot.lane.b32.xlu0 %v3061_v62, %s2700_s15  ;;  %s2614_s15 = scalar_lea.vmem %s3272_s24, 128 }
 0x756   : > { %p2615_p3 = scmp.ne.s32.totalorder %s3272_s24, %s2614_s15 }
 0x758   : > { %p2616_p5 = pnand %p2615_p3, %p3358_p7 }
 0x75a   : > { %p2617_p8 = pneg %p2616_p5 }
 0x774   : > { %1193 = vadd.xlane.f32.xlu0 %v1192_v23 }
 0x7c3   : > { %v1676_v8 = vpop.permute.xlu0 %1675  ;;  %v1673_v14 = vpop.permute.xlu1 %1672 }
 0x7c4   : > { %v1678_v16 = vsel %vm708_vm2, %v1673_v14, %v1676_v8 }
 0x7c5   : > { %v1679_v62 = vsel %vm707_vm11, %v1678_v16, %v1670_v7 }
 0x7c7   : > { %v2535_v1 = vpop.permute.xlu0 %2534 }
 0x7c8   : > { %v2537_v9 = vunpack.i.h.bf16 %v2535_v1  ;;  %v2536_v11 = vunpack.i.l.bf16 %v2535_v1 }
 0x7ca   : > { %v2412_v12 = vpack.c.bf16 %v2537_v9, %v2536_v11 }
 0x7cc   : > { %2414 = vmatpush3.bf16.msk.msra.mxu1 %vm3055_vm8, %v2412_v12 }
 0x7e4   : > { %v1562_v2 = vpop.f32.mrb[14].mxu1 }
 0x7e5   : > { %v2302_v13 = vpop.f32.mrb[15].mxu1 }
 0x7ec   : > { %v1758_v24 = vpop.f32.mrb[16].mxu1 }
 0x7ed   : > { %v1759_v17 = vadd.f32 %v1758_v24, %v1679_v62  ;;  %v2318_v18 = vpop.f32.mrb[17].mxu1 }
 0x7ef   : > { %v1762_v19 = vadd.f32 %v1759_v17, %v3092_v15 }
 0x7f1   : > { %v1763_v20 = vsel %vm900_vm12, %v1762_v19, -inf }
 0x7f2   : > { %1764 = vmax.xlane.f32.xlu1 %v1763_v20 }
 0x7f6   : > { %1482 = vadd.xlane.f32.xlu1 %v1481_v21 }
 0x801   : > { %v1194_v30 = vpop.xlane.xlu0 %1193 }
 0x87f   : > { %v1765_v61 = vpop.xlane.xlu1 %1764 }
 0x880   : > { %v1766_v22 = vsub.f32 %v1762_v19, %v1765_v61 }
 0x882   : > { %v1767_v25 = vmul.f32 1.442695, %v1766_v22 }
 0x883   : > { %v1483_v26 = vpop.xlane.xlu1 %1482 }
 0x884   : > { %2544 = vpow2.f32 %v1767_v25 }
 0x885   : > { %2546 = vrcp.f32 %v1483_v26 }
 0x886   : > { %2548 = vrcp.f32 %v1194_v30 }
 0x88e   : > { %v2545_v27 = vpop.eup %2544 }
 0x88f   : > { %v2547_v10 = vpop.eup %2546  ;;  %2324 = vmatmul.mubr.msk.f32.vlgmr.msra.gmra.mrb[18].mxu1 %vm900_vm12, %v2545_v27  ;;  %v1769_v29 = vsel %vm900_vm12, %v2545_v27, 0.0 }
 0x890   : > { %1770 = vadd.xlane.f32.xlu1 %v1769_v29  ;;  %v1566_v15 = vmul.f32 %v2547_v10, %v1562_v2  ;;  %v2549_v33 = vpop.eup %2548 }
 0x891   : > { %v1278_v34 = vmul.f32 %v2549_v33, %v3192_v37  ;;  %v2422_v37 = vpack.c.bf16 %v1876_v38, %v1875_v43 }
 0x892   : > { %1860 = vrot.lane.b32.xlu0 %v1566_v15, %s2701_s22  ;;  %s2620_s22 = scalar_lea.vmem %s2619_s30, 256 }
 0x893   : > { %2423 = vmatpush3.bf16.msra.mxu0 %v2422_v37  ;;  %p2622_p0 = scmp.lt.s32.totalorder %s2620_s22, %s2614_s15 }
 0x894   : > { %908 = vadd.xlane.f32.xlu1 %v907_v32  ;;  %2424 = vmatprep.subr.bf16.mxu0 %v2688_v0 }
 0x895   : > { %p2623_p1 = por %p2622_p0, %p2621_p9 }
 0x897   : > { %2426 = vmatpush3.bf16.msra.mxu0 %v2425_v46  ;;  %p2624_p11 = pnand %p2623_p1, %p2617_p8 }
 0x8a5   : > { %1856 = vrot.lane.b32.xlu1 %v1278_v34, %s2697_s29 }
 0x904   : > { %v1861_v0 = vpop.permute.xlu0 %1860 }
 0x91d   : > { %v1771_v47 = vpop.xlane.xlu1 %1770 }
 0x91e   : > { %2550 = vrcp.f32 %v1771_v47 }
 0x921   : > { %v909_v52 = vpop.xlane.xlu1 %908 }
 0x922   : > { %2552 = vrcp.f32 %v909_v52 }
 0x925   : > { %v1857_v57 = vpop.permute.xlu1 %1856 }
 0x928   : > { %v2551_v48 = vpop.eup %2550 }
 0x92c   : > { %v2553_v53 = vpop.eup %2552 }
 0x92d   : > { %v989_v54 = vmul.f32 %v2553_v53, %v3141_v55 }
 0x92f   : > { %v1867_v58 = vsel %vm708_vm2, %v989_v54, %v1857_v57 }
 0x930   : > { %v1868_v59 = vsel %vm440_vm1, %v1867_v58, %v1861_v0 }
 0x962   : > { %v1850_v49 = vpop.f32.mrb[18].mxu1 }
 0x963   : > { %v1854_v50 = vmul.f32 %v2551_v48, %v1850_v49  ;;  %v2325_v51 = vpop.f32.mrb[19].mxu1 }
 0x965   : > { %1864 = vrot.lane.b32.xlu1 %v1854_v50, %s2702_s27 }
 0x9d7   : > { %v1865_v28 = vpop.permute.xlu1 %1864 }
 0x9d8   : > { %v1870_v60 = vsel %vm1869_vm13, %v1868_v59, %v1865_v28 }
 0x9d9   : > { %2343 = vmatmul.mubr.msk.f32.vlgmr.msra.gmra.mrb[10].mxu0 %vm1879_vm14, %v1870_v60 }
 0xaac   : > { %v1949_v55 = vpop.f32.mrb[10].mxu0 }
 0xaad   : > { %1953 = vst.msk [vmem:[%s426_s0] sm:$0xff] %vm440_vm1, %v1949_v55  ;;  %v2344_v63 = vpop.f32.mrb[11].mxu0 }
 0xaae   : > { %2627 = shalt.err (!%p2624_p11)
}
 0xaaf   : > { %s2628_s20 = scalar_lea.hbm %s3270_s18, 128  ;;  %s2632_s11 = scalar_lea.hbm %s3325_s10, 256 }
 0xab0   : > { %p2629_p12 = scmp.ne.s32.totalorder %s3270_s18, %s2628_s20  ;;  %p2633_p10 = scmp.lt.u32.totalorder %s3270_s18, %s3325_s10 }
 0xab1   : > { %p2634_p6 = scmp.lt.u32.totalorder %s2632_s11, %s2628_s20  ;;  %p2636_p3 = scmp.lt.u32.totalorder %s2628_s20, %s3270_s18 }
 0xab2   : > { %p2630_p2 = pnand %p2629_p12, %p3358_p7 }
 0xab3   : > { %p2635_p13 = por %p2634_p6, %p2633_p10 }
 0xab4   : > { %p2631_p4 = pneg %p2630_p2 }
 0xab5   : > { %p2637_p5 = por %p2636_p3, %p2635_p13 }
 0xab7   : > { %p2638_p8 = pnand %p2637_p5, %p2631_p4 }
 0xab9   : > { %2641 = shalt.err (!%p2638_p8)
}
 0xaba   : > { %2431 = dma.vmem_to_hbm [thread:$0]  (%p3358_p7), %s3272_s24, 128, %s3270_s18, %s1955_s19  }
 0xabb PF: > { %s1980_s0 = sand.u32 1, %s2672_s13   ;;  %p3359_p9 = scmp.ne.s32.totalorder %s3340_s26, 0 }
 0xabc   : > { %p3360_p0 = scmp.ge.s32.totalorder %s2684_s16, 2  ;;  %s1981_s21 = scalar_lea.sflag [#allocation4], %s1980_s0 }
 0xabe   : > { %p2441_p1 = pnand %p3360_p0, %p3359_p9 }
 0xac0   : > { %2667 = dma.done.wait (!%p2441_p1), %s1981_s21, 128  }
 0xac1   : > { %2669 = vsyncadd (!%p2441_p1), %s1981_s21, 4294967168  ;;  %s3361_s16 = sld [smem:[#allocation12_spill]]  ;;  %s3362_s29 = sld [smem:[#allocation11_spill]] }
 0xac2   : > { %s3363_s15 = sld [smem:[#allocation13_spill]]  ;;  %s3364_s13 = smov %s2676_s14 }
 0xac7   : > { %p26_p11 = scmp.ge.s32.totalorder %s3361_s16, 4   ;;  %s3365_s14 = smov %s3362_s29 }
 0xac9   :  { %28 = sbr.rel (!%p26_p11) target bundleno = 9 (0x9), region = 121 }
 0xad0   :  { %1986 = vsyncpa [#allocation3], 1 }
 0xad1   :  { %1988 = vsyncpa [#allocation3 + $0x1], 1 }
 0xad2   :  { %1989 = vsyncpa [#allocation6], 1 }
 0xad3   :  { %1991 = vsyncpa [#allocation6 + $0x1], 1 }
 0xad4   :  { %1992 = vsyncpa [#allocation4], 1 }
 0xad5   :  { %1994 = vsyncpa [#allocation4 + $0x1], 1 }

</bundles_post_ra>
